<compile_context>
chip_gen: v6e
topology: v6e:2x2x1
jax: 0.10.0
libtpu: 0.0.40
codegen_flags: <defaults>
</compile_context>

<pallas_src>
import functools
import math

import jax
import jax.numpy as jnp
from jax import lax
from jax.experimental import pallas as pl
from jax.experimental.pallas import tpu as pltpu


# Row layout of the packed per-channel parameter slab (shape (_NUM_ROWS, C)).
_ROW_BT = 0       # text-projection bias
_ROW_LNI_W = 1    # image LayerNorm weight
_ROW_LNI_B = 2    # image LayerNorm bias
_ROW_LNT_W = 3    # text LayerNorm weight
_ROW_LNT_B = 4    # text LayerNorm bias
_ROW_BQ = 5       # q bias (pre-scaled by 1/sqrt(head_dim))
_ROW_BK = 6       # k bias
_ROW_BV = 7       # v bias
_ROW_BO = 8       # out-proj bias
_ROW_GAMMA = 9    # residual gate
_NUM_ROWS = 10


def _layernorm(x, w, b, eps=1e-5):
    mu = jnp.mean(x, axis=-1, keepdims=True)
    var = jnp.mean(jnp.square(x - mu), axis=-1, keepdims=True)
    return (x - mu) * lax.rsqrt(var + eps) * w + b


def _injector_kernel(num_heads, head_dim, C,
                     img_ref, txt_ref, wt_ref, w_all_ref, pp_ref,
                     out_ref,
                     q3_ref, k3_ref, v3_ref, merge_ref):
    img = img_ref[0].astype(jnp.float32)    # (TQ, C) image tokens, channels last
    txt = txt_ref[0].astype(jnp.float32)    # (T, Dt) text tokens

    def row(r):
        return pp_ref[r:r + 1, :]           # (1, C) packed per-channel vector

    # ---- text feature projection + LayerNorms ----
    # (text path is tiny; recomputed per query tile to keep the grid
    #  embarrassingly parallel)
    t = jnp.dot(txt, wt_ref[...], preferred_element_type=jnp.float32) + row(_ROW_BT)
    t_n = _layernorm(t, row(_ROW_LNT_W), row(_ROW_LNT_B))      # (T, C)
    i_n = _layernorm(img, row(_ROW_LNI_W), row(_ROW_LNI_B))    # (TQ, C)

    # ---- projections from the packed weight slab [Wq*s | Wk | Wv | Wo] ----
    q = jnp.dot(i_n, w_all_ref[:, 0:C],
                preferred_element_type=jnp.float32) + row(_ROW_BQ)   # pre-scaled
    kv = jnp.dot(t_n, w_all_ref[:, C:3 * C],
                 preferred_element_type=jnp.float32)                  # (T, 2C)
    k = kv[:, 0:C] + row(_ROW_BK)
    v = kv[:, C:2 * C] + row(_ROW_BV)

    # ---- split heads into scratch: (NH, TQ, hd) / (NH, T, hd) ----
    for h in range(num_heads):
        lo = h * head_dim
        hi = lo + head_dim
        q3_ref[h] = q[:, lo:hi]
        k3_ref[h] = k[:, lo:hi]
        v3_ref[h] = v[:, lo:hi]

    q3 = q3_ref[...]
    k3 = k3_ref[...]
    v3 = v3_ref[...]

    # ---- ONE batched scores matmul + softmax + ONE batched P@V over heads ----
    s = jnp.einsum('hqd,hkd->hqk', q3, k3,
                   preferred_element_type=jnp.float32)        # (NH, TQ, T)
    s = s - jnp.max(s, axis=-1, keepdims=True)
    p = jnp.exp(s)
    p = p * pl.reciprocal(jnp.sum(p, axis=-1, keepdims=True), approx=True)
    o3 = jnp.einsum('hqk,hkd->hqd', p, v3,
                    preferred_element_type=jnp.float32)       # (NH, TQ, hd)

    # ---- merge heads through scratch (no concatenate) + output projection ----
    for h in range(num_heads):
        lo = h * head_dim
        merge_ref[:, lo:lo + head_dim] = o3[h]
    attn = jnp.dot(merge_ref[...], w_all_ref[:, 3 * C:4 * C],
                   preferred_element_type=jnp.float32) + row(_ROW_BO)

    # ---- gamma-gated residual on the LayerNorm-ed image features ----
    out_ref[0] = (i_n + row(_ROW_GAMMA) * attn).astype(out_ref.dtype)


def injector_forward(image, text, params, num_heads=8, tq=None):
    B, C, H, W = image.shape
    HW = H * W
    _, T, Dt = text.shape
    assert C % num_heads == 0, "dim must be divisible by num_attn_head"
    head_dim = C // num_heads
    scale = 1.0 / math.sqrt(head_dim)

    if tq is None:
        tq = HW if HW <= 256 else 256
    assert HW % tq == 0 and tq % 8 == 0
    n_tq = HW // tq

    # --- host-side packing (free under jit) ---
    # [Wq*scale | Wk | Wv | Wo] : one (C, 4C) operand; scale folded into Wq/bq.
    w_all = jnp.concatenate([params["wq"] * scale, params["wk"],
                             params["wv"], params["wo"]], axis=1)
    pp = jnp.concatenate([params["bt"],
                          params["ln_i_w"], params["ln_i_b"],
                          params["ln_t_w"], params["ln_t_b"],
                          params["bq"] * scale, params["bk"], params["bv"],
                          params["bo"], params["gamma"]], axis=0)

    # NCHW -> (B, HW, C), channels last (lane axis).
    # TODO(synk): fuse this transpose into the pallas_call operand
    # (allow_input_fusion) to save one HBM round trip of the image.
    img_flat = jnp.transpose(image.reshape(B, C, HW), (0, 2, 1))

    kern = functools.partial(_injector_kernel, num_heads, head_dim, C)

    in_specs = [
        pl.BlockSpec((1, tq, C), lambda b, t: (b, t, 0)),    # image tile
        pl.BlockSpec((1, T, Dt), lambda b, t: (b, 0, 0)),    # text tokens
        pl.BlockSpec((Dt, C), lambda b, t: (0, 0)),          # text proj weight
        pl.BlockSpec((C, 4 * C), lambda b, t: (0, 0)),       # packed attn weights
        pl.BlockSpec((_NUM_ROWS, C), lambda b, t: (0, 0)),   # packed channel params
    ]
    out_spec = pl.BlockSpec((1, tq, C), lambda b, t: (b, t, 0))

    scratch = [
        pltpu.VMEM((num_heads, tq, head_dim), jnp.float32),   # q heads
        pltpu.VMEM((num_heads, T, head_dim), jnp.float32),    # k heads
        pltpu.VMEM((num_heads, T, head_dim), jnp.float32),    # v heads
        pltpu.VMEM((tq, C), jnp.float32),                     # merged heads
    ]

    # Scoped-VMEM bound derived from the actual block sizes (double-buffered
    # inputs/outputs + scratch), clamped well below v7x's 64 MiB physical VMEM.
    f32 = 4
    block_bytes = f32 * (2 * (tq * C + T * Dt + Dt * C + C * 4 * C + _NUM_ROWS * C)
                         + 2 * tq * C
                         + num_heads * (tq + 2 * T) * head_dim + tq * C)
    vmem_limit = int(min(64 * 1024 * 1024, max(8 * 1024 * 1024, 8 * block_bytes)))

    out = pl.pallas_call(
        kern,
        out_shape=jax.ShapeDtypeStruct((B, HW, C), image.dtype),
        grid_spec=pltpu.PrefetchScalarGridSpec(
            num_scalar_prefetch=0,
            grid=(B, n_tq),
            in_specs=in_specs,
            out_specs=out_spec,
            scratch_shapes=scratch),
        compiler_params=pltpu.CompilerParams(
            dimension_semantics=("parallel", "parallel"),
            vmem_limit_bytes=vmem_limit),
    )(img_flat, text, params["wt"], w_all, pp)

    # (B, HW, C) -> NCHW.
    return jnp.transpose(out, (0, 2, 1)).reshape(B, C, H, W)


def injector_ref(image, text, p, num_heads=8):
    """Pure-JAX reference matching the PyTorch forward."""
    B, C, H, W = image.shape
    HW = H * W
    x = jnp.transpose(image.reshape(B, C, HW), (0, 2, 1))

    def ln(z, w, b):
        mu = jnp.mean(z, -1, keepdims=True)
        var = jnp.mean(jnp.square(z - mu), -1, keepdims=True)
        return (z - mu) / jnp.sqrt(var + 1e-5) * w + b

    t = text @ p["wt"] + p["bt"]
    t = ln(t, p["ln_t_w"], p["ln_t_b"])
    x = ln(x, p["ln_i_w"], p["ln_i_b"])
    q = x @ p["wq"] + p["bq"]
    k = t @ p["wk"] + p["bk"]
    v = t @ p["wv"] + p["bv"]
    hd = C // num_heads

    def split(z):
        return z.reshape(B, -1, num_heads, hd).transpose(0, 2, 1, 3)

    qh, kh, vh = split(q), split(k), split(v)
    s = (qh @ kh.transpose(0, 1, 3, 2)) / jnp.sqrt(jnp.float32(hd))
    a = jax.nn.softmax(s, axis=-1)
    o = (a @ vh).transpose(0, 2, 1, 3).reshape(B, -1, C)
    o = o @ p["wo"] + p["bo"]
    x = x + p["gamma"] * o
    return jnp.transpose(x, (0, 2, 1)).reshape(B, C, H, W)


if __name__ == "__main__":
    B, C, H, W = 2, 32, 8, 8       # dim = C = 32
    T, Dt = 8, 48                  # text seq len, text_feature_dim
    NH = 8                         # num_attn_head

    key = jax.random.PRNGKey(0)
    ks = jax.random.split(key, 10)

    params = {
        # PyTorch Linear stores (out,in); we keep the transposed (in,out) layout.
        "wt": (jax.random.normal(ks[0], (Dt, C), jnp.float32)
               * jnp.sqrt(2.0 / Dt)),                         # kaiming_normal fan_in
        "bt": jax.random.normal(ks[1], (1, C), jnp.float32) * 0.02,
        "ln_i_w": jnp.ones((1, C), jnp.float32),
        "ln_i_b": jnp.zeros((1, C), jnp.float32),
        "ln_t_w": jnp.ones((1, C), jnp.float32),
        "ln_t_b": jnp.zeros((1, C), jnp.float32),
        "wq": jax.random.normal(ks[2], (C, C), jnp.float32) / jnp.sqrt(C),
        "bq": jnp.zeros((1, C), jnp.float32),
        "wk": jax.random.normal(ks[3], (C, C), jnp.float32) / jnp.sqrt(C),
        "bk": jnp.zeros((1, C), jnp.float32),
        "wv": jax.random.normal(ks[4], (C, C), jnp.float32) / jnp.sqrt(C),
        "bv": jnp.zeros((1, C), jnp.float32),
        "wo": jax.random.normal(ks[5], (C, C), jnp.float32) / jnp.sqrt(C),
        "bo": jnp.zeros((1, C), jnp.float32),
        # Module __init__ sets gamma = 0; we use 0.1 so the attention path
        # actually contributes and gets verified.
        "gamma": jnp.full((1, C), 0.1, jnp.float32),
    }

    image = jax.random.normal(ks[8], (B, C, H, W), jnp.float32)
    text = jax.random.normal(ks[9], (B, T, Dt), jnp.float32)

    # tq=32 -> grid (B, 2): exercises the query-tile axis as well as batch.
    out = injector_forward(image, text, params, num_heads=NH, tq=32)
    out = jax.block_until_ready(out)

    ref = injector_ref(image, text, params, num_heads=NH)
    assert out.shape == (B, C, H, W)
    # tolerance allows for the EUP approximate-reciprocal softmax denominator
    assert jnp.allclose(out, ref, atol=2e-3, rtol=2e-3), (
        float(jnp.max(jnp.abs(out - ref))))

    print("KERNEL_OK")
</pallas_src>

<mosaic_0001>
module attributes {stable_mosaic.version = 11 : i64} {
  func.func @_injector_kernel(%arg0: i32, %arg1: i32, %arg2: memref<1x32x32xf32, #tpu.memory_space<vmem>>, %arg3: memref<1x8x48xf32, #tpu.memory_space<vmem>>, %arg4: memref<48x32xf32, #tpu.memory_space<vmem>>, %arg5: memref<32x128xf32, #tpu.memory_space<vmem>>, %arg6: memref<10x32xf32, #tpu.memory_space<vmem>>, %arg7: memref<1x32x32xf32, #tpu.memory_space<vmem>>, %arg8: memref<8x32x4xf32, #tpu.memory_space<vmem>>, %arg9: memref<8x8x4xf32, #tpu.memory_space<vmem>>, %arg10: memref<8x8x4xf32, #tpu.memory_space<vmem>>, %arg11: memref<32x32xf32, #tpu.memory_space<vmem>>) attributes {dimension_semantics = [#tpu.dimension_semantics<parallel>, #tpu.dimension_semantics<parallel>], iteration_bounds = array<i64: 2, 2>, scalar_prefetch = 0 : i64, scratch_operands = 4 : i64, tpu.core_type = #tpu.core_type<tc>, window_params = [{transform_indices = @transform_0, window_bounds = array<i64: 1, 32, 32>}, {transform_indices = @transform_1, window_bounds = array<i64: 1, 8, 48>}, {pipeline_mode = #tpu.pipeline_mode<synchronous>, transform_indices = @transform_2, window_bounds = array<i64: 48, 32>}, {pipeline_mode = #tpu.pipeline_mode<synchronous>, transform_indices = @transform_3, window_bounds = array<i64: 32, 128>}, {pipeline_mode = #tpu.pipeline_mode<synchronous>, transform_indices = @transform_4, window_bounds = array<i64: 10, 32>}, {transform_indices = @transform_5, window_bounds = array<i64: 1, 32, 32>}]} {
    %c0 = arith.constant 0 : index
    %c0_0 = arith.constant 0 : index
    %c0_1 = arith.constant 0 : index
    %0 = vector.load %arg2[%c0, %c0_0, %c0_1] : memref<1x32x32xf32, #tpu.memory_space<vmem>>, vector<1x32x32xf32>
    %1 = vector.shape_cast %0 : vector<1x32x32xf32> to vector<32x32xf32>
    %c0_2 = arith.constant 0 : index
    %c0_3 = arith.constant 0 : index
    %c0_4 = arith.constant 0 : index
    %2 = vector.load %arg3[%c0_2, %c0_3, %c0_4] : memref<1x8x48xf32, #tpu.memory_space<vmem>>, vector<1x8x48xf32>
    %3 = vector.shape_cast %2 : vector<1x8x48xf32> to vector<8x48xf32>
    %c0_5 = arith.constant 0 : index
    %c0_6 = arith.constant 0 : index
    %4 = vector.load %arg4[%c0_5, %c0_6] : memref<48x32xf32, #tpu.memory_space<vmem>>, vector<48x32xf32>
    %cst = arith.constant dense<0.000000e+00> : vector<8x32xf32>
    %5 = tpu.matmul %3, %4, %cst {dimension_numbers = #tpu.dot_dimension_numbers<[1], [0], [0], [1], [0, 0, 1, 1], [], []>} : vector<8x48xf32>, vector<48x32xf32>, vector<8x32xf32> -> vector<8x32xf32>
    %c0_7 = arith.constant 0 : index
    %c0_8 = arith.constant 0 : index
    %6 = vector.load %arg6[%c0_7, %c0_8] : memref<10x32xf32, #tpu.memory_space<vmem>>, vector<1x32xf32>
    %7 = vector.broadcast %6 : vector<1x32xf32> to vector<8x32xf32>
    %8 = arith.addf %5, %7 : vector<8x32xf32>
    %c3 = arith.constant 3 : index
    %c0_9 = arith.constant 0 : index
    %9 = vector.load %arg6[%c3, %c0_9] : memref<10x32xf32, #tpu.memory_space<vmem>>, vector<1x32xf32>
    %c4 = arith.constant 4 : index
    %c0_10 = arith.constant 0 : index
    %10 = vector.load %arg6[%c4, %c0_10] : memref<10x32xf32, #tpu.memory_space<vmem>>, vector<1x32xf32>
    %cst_11 = arith.constant dense<0.000000e+00> : vector<8xf32>
    %11 = vector.multi_reduction <add>, %8, %cst_11 [1] : vector<8x32xf32> to vector<8xf32>
    %12 = vector.shape_cast %11 : vector<8xf32> to vector<8x1xf32>
    %cst_12 = arith.constant 3.200000e+01 : f32
    %13 = vector.broadcast %cst_12 : f32 to vector<8x1xf32>
    %14 = arith.divf %12, %13 : vector<8x1xf32>
    %15 = vector.broadcast %14 : vector<8x1xf32> to vector<8x32xf32>
    %16 = arith.subf %8, %15 : vector<8x32xf32>
    %17 = arith.mulf %16, %16 : vector<8x32xf32>
    %cst_13 = arith.constant dense<0.000000e+00> : vector<8xf32>
    %18 = vector.multi_reduction <add>, %17, %cst_13 [1] : vector<8x32xf32> to vector<8xf32>
    %19 = vector.shape_cast %18 : vector<8xf32> to vector<8x1xf32>
    %cst_14 = arith.constant 3.200000e+01 : f32
    %20 = vector.broadcast %cst_14 : f32 to vector<8x1xf32>
    %21 = arith.divf %19, %20 : vector<8x1xf32>
    %22 = vector.broadcast %14 : vector<8x1xf32> to vector<8x32xf32>
    %23 = arith.subf %8, %22 : vector<8x32xf32>
    %cst_15 = arith.constant 9.99999974E-6 : f32
    %24 = vector.broadcast %cst_15 : f32 to vector<8x1xf32>
    %25 = arith.addf %21, %24 : vector<8x1xf32>
    %26 = math.rsqrt %25 : vector<8x1xf32>
    %27 = vector.broadcast %26 : vector<8x1xf32> to vector<8x32xf32>
    %28 = arith.mulf %23, %27 : vector<8x32xf32>
    %29 = vector.broadcast %9 : vector<1x32xf32> to vector<8x32xf32>
    %30 = arith.mulf %28, %29 : vector<8x32xf32>
    %31 = vector.broadcast %10 : vector<1x32xf32> to vector<8x32xf32>
    %32 = arith.addf %30, %31 : vector<8x32xf32>
    %c1 = arith.constant 1 : index
    %c0_16 = arith.constant 0 : index
    %33 = vector.load %arg6[%c1, %c0_16] : memref<10x32xf32, #tpu.memory_space<vmem>>, vector<1x32xf32>
    %c2 = arith.constant 2 : index
    %c0_17 = arith.constant 0 : index
    %34 = vector.load %arg6[%c2, %c0_17] : memref<10x32xf32, #tpu.memory_space<vmem>>, vector<1x32xf32>
    %cst_18 = arith.constant dense<0.000000e+00> : vector<32xf32>
    %35 = vector.multi_reduction <add>, %1, %cst_18 [1] : vector<32x32xf32> to vector<32xf32>
    %36 = vector.shape_cast %35 : vector<32xf32> to vector<32x1xf32>
    %cst_19 = arith.constant 3.200000e+01 : f32
    %37 = vector.broadcast %cst_19 : f32 to vector<32x1xf32>
    %38 = arith.divf %36, %37 : vector<32x1xf32>
    %39 = vector.broadcast %38 : vector<32x1xf32> to vector<32x32xf32>
    %40 = arith.subf %1, %39 : vector<32x32xf32>
    %41 = arith.mulf %40, %40 : vector<32x32xf32>
    %cst_20 = arith.constant dense<0.000000e+00> : vector<32xf32>
    %42 = vector.multi_reduction <add>, %41, %cst_20 [1] : vector<32x32xf32> to vector<32xf32>
    %43 = vector.shape_cast %42 : vector<32xf32> to vector<32x1xf32>
    %cst_21 = arith.constant 3.200000e+01 : f32
    %44 = vector.broadcast %cst_21 : f32 to vector<32x1xf32>
    %45 = arith.divf %43, %44 : vector<32x1xf32>
    %46 = vector.broadcast %38 : vector<32x1xf32> to vector<32x32xf32>
    %47 = arith.subf %1, %46 : vector<32x32xf32>
    %cst_22 = arith.constant 9.99999974E-6 : f32
    %48 = vector.broadcast %cst_22 : f32 to vector<32x1xf32>
    %49 = arith.addf %45, %48 : vector<32x1xf32>
    %50 = math.rsqrt %49 : vector<32x1xf32>
    %51 = vector.broadcast %50 : vector<32x1xf32> to vector<32x32xf32>
    %52 = arith.mulf %47, %51 : vector<32x32xf32>
    %53 = vector.broadcast %33 : vector<1x32xf32> to vector<32x32xf32>
    %54 = arith.mulf %52, %53 : vector<32x32xf32>
    %55 = vector.broadcast %34 : vector<1x32xf32> to vector<32x32xf32>
    %56 = arith.addf %54, %55 : vector<32x32xf32>
    %c0_23 = arith.constant 0 : index
    %c0_24 = arith.constant 0 : index
    %57 = vector.load %arg5[%c0_23, %c0_24] : memref<32x128xf32, #tpu.memory_space<vmem>>, vector<32x32xf32>
    %cst_25 = arith.constant dense<0.000000e+00> : vector<32x32xf32>
    %58 = tpu.matmul %56, %57, %cst_25 {dimension_numbers = #tpu.dot_dimension_numbers<[1], [0], [0], [1], [0, 0, 1, 1], [], []>} : vector<32x32xf32>, vector<32x32xf32>, vector<32x32xf32> -> vector<32x32xf32>
    %c5 = arith.constant 5 : index
    %c0_26 = arith.constant 0 : index
    %59 = vector.load %arg6[%c5, %c0_26] : memref<10x32xf32, #tpu.memory_space<vmem>>, vector<1x32xf32>
    %60 = vector.broadcast %59 : vector<1x32xf32> to vector<32x32xf32>
    %61 = arith.addf %58, %60 : vector<32x32xf32>
    %c0_27 = arith.constant 0 : index
    %c32 = arith.constant 32 : index
    %62 = vector.load %arg5[%c0_27, %c32] : memref<32x128xf32, #tpu.memory_space<vmem>>, vector<32x64xf32>
    %cst_28 = arith.constant dense<0.000000e+00> : vector<8x64xf32>
    %63 = tpu.matmul %32, %62, %cst_28 {dimension_numbers = #tpu.dot_dimension_numbers<[1], [0], [0], [1], [0, 0, 1, 1], [], []>} : vector<8x32xf32>, vector<32x64xf32>, vector<8x64xf32> -> vector<8x64xf32>
    %64 = vector.extract_strided_slice %63 {offsets = [0, 0], sizes = [8, 32], strides = [1, 1]} : vector<8x64xf32> to vector<8x32xf32>
    %c6 = arith.constant 6 : index
    %c0_29 = arith.constant 0 : index
    %65 = vector.load %arg6[%c6, %c0_29] : memref<10x32xf32, #tpu.memory_space<vmem>>, vector<1x32xf32>
    %66 = vector.broadcast %65 : vector<1x32xf32> to vector<8x32xf32>
    %67 = arith.addf %64, %66 : vector<8x32xf32>
    %68 = vector.extract_strided_slice %63 {offsets = [0, 32], sizes = [8, 32], strides = [1, 1]} : vector<8x64xf32> to vector<8x32xf32>
    %c7 = arith.constant 7 : index
    %c0_30 = arith.constant 0 : index
    %69 = vector.load %arg6[%c7, %c0_30] : memref<10x32xf32, #tpu.memory_space<vmem>>, vector<1x32xf32>
    %70 = vector.broadcast %69 : vector<1x32xf32> to vector<8x32xf32>
    %71 = arith.addf %68, %70 : vector<8x32xf32>
    %72 = vector.extract_strided_slice %61 {offsets = [0, 0], sizes = [32, 4], strides = [1, 1]} : vector<32x32xf32> to vector<32x4xf32>
    %c0_31 = arith.constant 0 : index
    %c0_32 = arith.constant 0 : index
    %c0_33 = arith.constant 0 : index
    %73 = vector.load %arg8[%c0_31, %c0_32, %c0_33] : memref<8x32x4xf32, #tpu.memory_space<vmem>>, vector<1x32x4xf32>
    %74 = vector.shape_cast %73 : vector<1x32x4xf32> to vector<32x4xf32>
    %75 = vector.shape_cast %72 : vector<32x4xf32> to vector<1x32x4xf32>
    tpu.vector_store %arg8[%c0_31, %c0_32, %c0_33], %75 {strides = array<i32>} : memref<8x32x4xf32, #tpu.memory_space<vmem>>, vector<1x32x4xf32>,
    %76 = vector.extract_strided_slice %67 {offsets = [0, 0], sizes = [8, 4], strides = [1, 1]} : vector<8x32xf32> to vector<8x4xf32>
    %c0_34 = arith.constant 0 : index
    %c0_35 = arith.constant 0 : index
    %c0_36 = arith.constant 0 : index
    %77 = vector.load %arg9[%c0_34, %c0_35, %c0_36] : memref<8x8x4xf32, #tpu.memory_space<vmem>>, vector<1x8x4xf32>
    %78 = vector.shape_cast %77 : vector<1x8x4xf32> to vector<8x4xf32>
    %79 = vector.shape_cast %76 : vector<8x4xf32> to vector<1x8x4xf32>
    tpu.vector_store %arg9[%c0_34, %c0_35, %c0_36], %79 {strides = array<i32>} : memref<8x8x4xf32, #tpu.memory_space<vmem>>, vector<1x8x4xf32>,
    %80 = vector.extract_strided_slice %71 {offsets = [0, 0], sizes = [8, 4], strides = [1, 1]} : vector<8x32xf32> to vector<8x4xf32>
    %c0_37 = arith.constant 0 : index
    %c0_38 = arith.constant 0 : index
    %c0_39 = arith.constant 0 : index
    %81 = vector.load %arg10[%c0_37, %c0_38, %c0_39] : memref<8x8x4xf32, #tpu.memory_space<vmem>>, vector<1x8x4xf32>
    %82 = vector.shape_cast %81 : vector<1x8x4xf32> to vector<8x4xf32>
    %83 = vector.shape_cast %80 : vector<8x4xf32> to vector<1x8x4xf32>
    tpu.vector_store %arg10[%c0_37, %c0_38, %c0_39], %83 {strides = array<i32>} : memref<8x8x4xf32, #tpu.memory_space<vmem>>, vector<1x8x4xf32>,
    %84 = vector.extract_strided_slice %61 {offsets = [0, 4], sizes = [32, 4], strides = [1, 1]} : vector<32x32xf32> to vector<32x4xf32>
    %c1_40 = arith.constant 1 : index
    %c0_41 = arith.constant 0 : index
    %c0_42 = arith.constant 0 : index
    %85 = vector.load %arg8[%c1_40, %c0_41, %c0_42] : memref<8x32x4xf32, #tpu.memory_space<vmem>>, vector<1x32x4xf32>
    %86 = vector.shape_cast %85 : vector<1x32x4xf32> to vector<32x4xf32>
    %87 = vector.shape_cast %84 : vector<32x4xf32> to vector<1x32x4xf32>
    tpu.vector_store %arg8[%c1_40, %c0_41, %c0_42], %87 {strides = array<i32>} : memref<8x32x4xf32, #tpu.memory_space<vmem>>, vector<1x32x4xf32>,
    %88 = vector.extract_strided_slice %67 {offsets = [0, 4], sizes = [8, 4], strides = [1, 1]} : vector<8x32xf32> to vector<8x4xf32>
    %c1_43 = arith.constant 1 : index
    %c0_44 = arith.constant 0 : index
    %c0_45 = arith.constant 0 : index
    %89 = vector.load %arg9[%c1_43, %c0_44, %c0_45] : memref<8x8x4xf32, #tpu.memory_space<vmem>>, vector<1x8x4xf32>
    %90 = vector.shape_cast %89 : vector<1x8x4xf32> to vector<8x4xf32>
    %91 = vector.shape_cast %88 : vector<8x4xf32> to vector<1x8x4xf32>
    tpu.vector_store %arg9[%c1_43, %c0_44, %c0_45], %91 {strides = array<i32>} : memref<8x8x4xf32, #tpu.memory_space<vmem>>, vector<1x8x4xf32>,
    %92 = vector.extract_strided_slice %71 {offsets = [0, 4], sizes = [8, 4], strides = [1, 1]} : vector<8x32xf32> to vector<8x4xf32>
    %c1_46 = arith.constant 1 : index
    %c0_47 = arith.constant 0 : index
    %c0_48 = arith.constant 0 : index
    %93 = vector.load %arg10[%c1_46, %c0_47, %c0_48] : memref<8x8x4xf32, #tpu.memory_space<vmem>>, vector<1x8x4xf32>
    %94 = vector.shape_cast %93 : vector<1x8x4xf32> to vector<8x4xf32>
    %95 = vector.shape_cast %92 : vector<8x4xf32> to vector<1x8x4xf32>
    tpu.vector_store %arg10[%c1_46, %c0_47, %c0_48], %95 {strides = array<i32>} : memref<8x8x4xf32, #tpu.memory_space<vmem>>, vector<1x8x4xf32>,
    %96 = vector.extract_strided_slice %61 {offsets = [0, 8], sizes = [32, 4], strides = [1, 1]} : vector<32x32xf32> to vector<32x4xf32>
    %c2_49 = arith.constant 2 : index
    %c0_50 = arith.constant 0 : index
    %c0_51 = arith.constant 0 : index
    %97 = vector.load %arg8[%c2_49, %c0_50, %c0_51] : memref<8x32x4xf32, #tpu.memory_space<vmem>>, vector<1x32x4xf32>
    %98 = vector.shape_cast %97 : vector<1x32x4xf32> to vector<32x4xf32>
    %99 = vector.shape_cast %96 : vector<32x4xf32> to vector<1x32x4xf32>
    tpu.vector_store %arg8[%c2_49, %c0_50, %c0_51], %99 {strides = array<i32>} : memref<8x32x4xf32, #tpu.memory_space<vmem>>, vector<1x32x4xf32>,
    %100 = vector.extract_strided_slice %67 {offsets = [0, 8], sizes = [8, 4], strides = [1, 1]} : vector<8x32xf32> to vector<8x4xf32>
    %c2_52 = arith.constant 2 : index
    %c0_53 = arith.constant 0 : index
    %c0_54 = arith.constant 0 : index
    %101 = vector.load %arg9[%c2_52, %c0_53, %c0_54] : memref<8x8x4xf32, #tpu.memory_space<vmem>>, vector<1x8x4xf32>
    %102 = vector.shape_cast %101 : vector<1x8x4xf32> to vector<8x4xf32>
    %103 = vector.shape_cast %100 : vector<8x4xf32> to vector<1x8x4xf32>
    tpu.vector_store %arg9[%c2_52, %c0_53, %c0_54], %103 {strides = array<i32>} : memref<8x8x4xf32, #tpu.memory_space<vmem>>, vector<1x8x4xf32>,
    %104 = vector.extract_strided_slice %71 {offsets = [0, 8], sizes = [8, 4], strides = [1, 1]} : vector<8x32xf32> to vector<8x4xf32>
    %c2_55 = arith.constant 2 : index
    %c0_56 = arith.constant 0 : index
    %c0_57 = arith.constant 0 : index
    %105 = vector.load %arg10[%c2_55, %c0_56, %c0_57] : memref<8x8x4xf32, #tpu.memory_space<vmem>>, vector<1x8x4xf32>
    %106 = vector.shape_cast %105 : vector<1x8x4xf32> to vector<8x4xf32>
    %107 = vector.shape_cast %104 : vector<8x4xf32> to vector<1x8x4xf32>
    tpu.vector_store %arg10[%c2_55, %c0_56, %c0_57], %107 {strides = array<i32>} : memref<8x8x4xf32, #tpu.memory_space<vmem>>, vector<1x8x4xf32>,
    %108 = vector.extract_strided_slice %61 {offsets = [0, 12], sizes = [32, 4], strides = [1, 1]} : vector<32x32xf32> to vector<32x4xf32>
    %c3_58 = arith.constant 3 : index
    %c0_59 = arith.constant 0 : index
    %c0_60 = arith.constant 0 : index
    %109 = vector.load %arg8[%c3_58, %c0_59, %c0_60] : memref<8x32x4xf32, #tpu.memory_space<vmem>>, vector<1x32x4xf32>
    %110 = vector.shape_cast %109 : vector<1x32x4xf32> to vector<32x4xf32>
    %111 = vector.shape_cast %108 : vector<32x4xf32> to vector<1x32x4xf32>
    tpu.vector_store %arg8[%c3_58, %c0_59, %c0_60], %111 {strides = array<i32>} : memref<8x32x4xf32, #tpu.memory_space<vmem>>, vector<1x32x4xf32>,
    %112 = vector.extract_strided_slice %67 {offsets = [0, 12], sizes = [8, 4], strides = [1, 1]} : vector<8x32xf32> to vector<8x4xf32>
    %c3_61 = arith.constant 3 : index
    %c0_62 = arith.constant 0 : index
    %c0_63 = arith.constant 0 : index
    %113 = vector.load %arg9[%c3_61, %c0_62, %c0_63] : memref<8x8x4xf32, #tpu.memory_space<vmem>>, vector<1x8x4xf32>
    %114 = vector.shape_cast %113 : vector<1x8x4xf32> to vector<8x4xf32>
    %115 = vector.shape_cast %112 : vector<8x4xf32> to vector<1x8x4xf32>
    tpu.vector_store %arg9[%c3_61, %c0_62, %c0_63], %115 {strides = array<i32>} : memref<8x8x4xf32, #tpu.memory_space<vmem>>, vector<1x8x4xf32>,
    %116 = vector.extract_strided_slice %71 {offsets = [0, 12], sizes = [8, 4], strides = [1, 1]} : vector<8x32xf32> to vector<8x4xf32>
    %c3_64 = arith.constant 3 : index
    %c0_65 = arith.constant 0 : index
    %c0_66 = arith.constant 0 : index
    %117 = vector.load %arg10[%c3_64, %c0_65, %c0_66] : memref<8x8x4xf32, #tpu.memory_space<vmem>>, vector<1x8x4xf32>
    %118 = vector.shape_cast %117 : vector<1x8x4xf32> to vector<8x4xf32>
    %119 = vector.shape_cast %116 : vector<8x4xf32> to vector<1x8x4xf32>
    tpu.vector_store %arg10[%c3_64, %c0_65, %c0_66], %119 {strides = array<i32>} : memref<8x8x4xf32, #tpu.memory_space<vmem>>, vector<1x8x4xf32>,
    %120 = vector.extract_strided_slice %61 {offsets = [0, 16], sizes = [32, 4], strides = [1, 1]} : vector<32x32xf32> to vector<32x4xf32>
    %c4_67 = arith.constant 4 : index
    %c0_68 = arith.constant 0 : index
    %c0_69 = arith.constant 0 : index
    %121 = vector.load %arg8[%c4_67, %c0_68, %c0_69] : memref<8x32x4xf32, #tpu.memory_space<vmem>>, vector<1x32x4xf32>
    %122 = vector.shape_cast %121 : vector<1x32x4xf32> to vector<32x4xf32>
    %123 = vector.shape_cast %120 : vector<32x4xf32> to vector<1x32x4xf32>
    tpu.vector_store %arg8[%c4_67, %c0_68, %c0_69], %123 {strides = array<i32>} : memref<8x32x4xf32, #tpu.memory_space<vmem>>, vector<1x32x4xf32>,
    %124 = vector.extract_strided_slice %67 {offsets = [0, 16], sizes = [8, 4], strides = [1, 1]} : vector<8x32xf32> to vector<8x4xf32>
    %c4_70 = arith.constant 4 : index
    %c0_71 = arith.constant 0 : index
    %c0_72 = arith.constant 0 : index
    %125 = vector.load %arg9[%c4_70, %c0_71, %c0_72] : memref<8x8x4xf32, #tpu.memory_space<vmem>>, vector<1x8x4xf32>
    %126 = vector.shape_cast %125 : vector<1x8x4xf32> to vector<8x4xf32>
    %127 = vector.shape_cast %124 : vector<8x4xf32> to vector<1x8x4xf32>
    tpu.vector_store %arg9[%c4_70, %c0_71, %c0_72], %127 {strides = array<i32>} : memref<8x8x4xf32, #tpu.memory_space<vmem>>, vector<1x8x4xf32>,
    %128 = vector.extract_strided_slice %71 {offsets = [0, 16], sizes = [8, 4], strides = [1, 1]} : vector<8x32xf32> to vector<8x4xf32>
    %c4_73 = arith.constant 4 : index
    %c0_74 = arith.constant 0 : index
    %c0_75 = arith.constant 0 : index
    %129 = vector.load %arg10[%c4_73, %c0_74, %c0_75] : memref<8x8x4xf32, #tpu.memory_space<vmem>>, vector<1x8x4xf32>
    %130 = vector.shape_cast %129 : vector<1x8x4xf32> to vector<8x4xf32>
    %131 = vector.shape_cast %128 : vector<8x4xf32> to vector<1x8x4xf32>
    tpu.vector_store %arg10[%c4_73, %c0_74, %c0_75], %131 {strides = array<i32>} : memref<8x8x4xf32, #tpu.memory_space<vmem>>, vector<1x8x4xf32>,
    %132 = vector.extract_strided_slice %61 {offsets = [0, 20], sizes = [32, 4], strides = [1, 1]} : vector<32x32xf32> to vector<32x4xf32>
    %c5_76 = arith.constant 5 : index
    %c0_77 = arith.constant 0 : index
    %c0_78 = arith.constant 0 : index
    %133 = vector.load %arg8[%c5_76, %c0_77, %c0_78] : memref<8x32x4xf32, #tpu.memory_space<vmem>>, vector<1x32x4xf32>
    %134 = vector.shape_cast %133 : vector<1x32x4xf32> to vector<32x4xf32>
    %135 = vector.shape_cast %132 : vector<32x4xf32> to vector<1x32x4xf32>
    tpu.vector_store %arg8[%c5_76, %c0_77, %c0_78], %135 {strides = array<i32>} : memref<8x32x4xf32, #tpu.memory_space<vmem>>, vector<1x32x4xf32>,
    %136 = vector.extract_strided_slice %67 {offsets = [0, 20], sizes = [8, 4], strides = [1, 1]} : vector<8x32xf32> to vector<8x4xf32>
    %c5_79 = arith.constant 5 : index
    %c0_80 = arith.constant 0 : index
    %c0_81 = arith.constant 0 : index
    %137 = vector.load %arg9[%c5_79, %c0_80, %c0_81] : memref<8x8x4xf32, #tpu.memory_space<vmem>>, vector<1x8x4xf32>
    %138 = vector.shape_cast %137 : vector<1x8x4xf32> to vector<8x4xf32>
    %139 = vector.shape_cast %136 : vector<8x4xf32> to vector<1x8x4xf32>
    tpu.vector_store %arg9[%c5_79, %c0_80, %c0_81], %139 {strides = array<i32>} : memref<8x8x4xf32, #tpu.memory_space<vmem>>, vector<1x8x4xf32>,
    %140 = vector.extract_strided_slice %71 {offsets = [0, 20], sizes = [8, 4], strides = [1, 1]} : vector<8x32xf32> to vector<8x4xf32>
    %c5_82 = arith.constant 5 : index
    %c0_83 = arith.constant 0 : index
    %c0_84 = arith.constant 0 : index
    %141 = vector.load %arg10[%c5_82, %c0_83, %c0_84] : memref<8x8x4xf32, #tpu.memory_space<vmem>>, vector<1x8x4xf32>
    %142 = vector.shape_cast %141 : vector<1x8x4xf32> to vector<8x4xf32>
    %143 = vector.shape_cast %140 : vector<8x4xf32> to vector<1x8x4xf32>
    tpu.vector_store %arg10[%c5_82, %c0_83, %c0_84], %143 {strides = array<i32>} : memref<8x8x4xf32, #tpu.memory_space<vmem>>, vector<1x8x4xf32>,
    %144 = vector.extract_strided_slice %61 {offsets = [0, 24], sizes = [32, 4], strides = [1, 1]} : vector<32x32xf32> to vector<32x4xf32>
    %c6_85 = arith.constant 6 : index
    %c0_86 = arith.constant 0 : index
    %c0_87 = arith.constant 0 : index
    %145 = vector.load %arg8[%c6_85, %c0_86, %c0_87] : memref<8x32x4xf32, #tpu.memory_space<vmem>>, vector<1x32x4xf32>
    %146 = vector.shape_cast %145 : vector<1x32x4xf32> to vector<32x4xf32>
    %147 = vector.shape_cast %144 : vector<32x4xf32> to vector<1x32x4xf32>
    tpu.vector_store %arg8[%c6_85, %c0_86, %c0_87], %147 {strides = array<i32>} : memref<8x32x4xf32, #tpu.memory_space<vmem>>, vector<1x32x4xf32>,
    %148 = vector.extract_strided_slice %67 {offsets = [0, 24], sizes = [8, 4], strides = [1, 1]} : vector<8x32xf32> to vector<8x4xf32>
    %c6_88 = arith.constant 6 : index
    %c0_89 = arith.constant 0 : index
    %c0_90 = arith.constant 0 : index
    %149 = vector.load %arg9[%c6_88, %c0_89, %c0_90] : memref<8x8x4xf32, #tpu.memory_space<vmem>>, vector<1x8x4xf32>
    %150 = vector.shape_cast %149 : vector<1x8x4xf32> to vector<8x4xf32>
    %151 = vector.shape_cast %148 : vector<8x4xf32> to vector<1x8x4xf32>
    tpu.vector_store %arg9[%c6_88, %c0_89, %c0_90], %151 {strides = array<i32>} : memref<8x8x4xf32, #tpu.memory_space<vmem>>, vector<1x8x4xf32>,
    %152 = vector.extract_strided_slice %71 {offsets = [0, 24], sizes = [8, 4], strides = [1, 1]} : vector<8x32xf32> to vector<8x4xf32>
    %c6_91 = arith.constant 6 : index
    %c0_92 = arith.constant 0 : index
    %c0_93 = arith.constant 0 : index
    %153 = vector.load %arg10[%c6_91, %c0_92, %c0_93] : memref<8x8x4xf32, #tpu.memory_space<vmem>>, vector<1x8x4xf32>
    %154 = vector.shape_cast %153 : vector<1x8x4xf32> to vector<8x4xf32>
    %155 = vector.shape_cast %152 : vector<8x4xf32> to vector<1x8x4xf32>
    tpu.vector_store %arg10[%c6_91, %c0_92, %c0_93], %155 {strides = array<i32>} : memref<8x8x4xf32, #tpu.memory_space<vmem>>, vector<1x8x4xf32>,
    %156 = vector.extract_strided_slice %61 {offsets = [0, 28], sizes = [32, 4], strides = [1, 1]} : vector<32x32xf32> to vector<32x4xf32>
    %c7_94 = arith.constant 7 : index
    %c0_95 = arith.constant 0 : index
    %c0_96 = arith.constant 0 : index
    %157 = vector.load %arg8[%c7_94, %c0_95, %c0_96] : memref<8x32x4xf32, #tpu.memory_space<vmem>>, vector<1x32x4xf32>
    %158 = vector.shape_cast %157 : vector<1x32x4xf32> to vector<32x4xf32>
    %159 = vector.shape_cast %156 : vector<32x4xf32> to vector<1x32x4xf32>
    tpu.vector_store %arg8[%c7_94, %c0_95, %c0_96], %159 {strides = array<i32>} : memref<8x32x4xf32, #tpu.memory_space<vmem>>, vector<1x32x4xf32>,
    %160 = vector.extract_strided_slice %67 {offsets = [0, 28], sizes = [8, 4], strides = [1, 1]} : vector<8x32xf32> to vector<8x4xf32>
    %c7_97 = arith.constant 7 : index
    %c0_98 = arith.constant 0 : index
    %c0_99 = arith.constant 0 : index
    %161 = vector.load %arg9[%c7_97, %c0_98, %c0_99] : memref<8x8x4xf32, #tpu.memory_space<vmem>>, vector<1x8x4xf32>
    %162 = vector.shape_cast %161 : vector<1x8x4xf32> to vector<8x4xf32>
    %163 = vector.shape_cast %160 : vector<8x4xf32> to vector<1x8x4xf32>
    tpu.vector_store %arg9[%c7_97, %c0_98, %c0_99], %163 {strides = array<i32>} : memref<8x8x4xf32, #tpu.memory_space<vmem>>, vector<1x8x4xf32>,
    %164 = vector.extract_strided_slice %71 {offsets = [0, 28], sizes = [8, 4], strides = [1, 1]} : vector<8x32xf32> to vector<8x4xf32>
    %c7_100 = arith.constant 7 : index
    %c0_101 = arith.constant 0 : index
    %c0_102 = arith.constant 0 : index
    %165 = vector.load %arg10[%c7_100, %c0_101, %c0_102] : memref<8x8x4xf32, #tpu.memory_space<vmem>>, vector<1x8x4xf32>
    %166 = vector.shape_cast %165 : vector<1x8x4xf32> to vector<8x4xf32>
    %167 = vector.shape_cast %164 : vector<8x4xf32> to vector<1x8x4xf32>
    tpu.vector_store %arg10[%c7_100, %c0_101, %c0_102], %167 {strides = array<i32>} : memref<8x8x4xf32, #tpu.memory_space<vmem>>, vector<1x8x4xf32>,
    %c0_103 = arith.constant 0 : index
    %c0_104 = arith.constant 0 : index
    %c0_105 = arith.constant 0 : index
    %168 = vector.load %arg8[%c0_103, %c0_104, %c0_105] : memref<8x32x4xf32, #tpu.memory_space<vmem>>, vector<8x32x4xf32>
    %c0_106 = arith.constant 0 : index
    %c0_107 = arith.constant 0 : index
    %c0_108 = arith.constant 0 : index
    %169 = vector.load %arg9[%c0_106, %c0_107, %c0_108] : memref<8x8x4xf32, #tpu.memory_space<vmem>>, vector<8x8x4xf32>
    %c0_109 = arith.constant 0 : index
    %c0_110 = arith.constant 0 : index
    %c0_111 = arith.constant 0 : index
    %170 = vector.load %arg10[%c0_109, %c0_110, %c0_111] : memref<8x8x4xf32, #tpu.memory_space<vmem>>, vector<8x8x4xf32>
    "tpu.trace_start"() <{level = 10 : i32, message = "hqd,hkd->hqk"}> : () -> ()
    %cst_112 = arith.constant dense<0.000000e+00> : vector<8x32x8xf32>
    %171 = tpu.matmul %168, %169, %cst_112 {dimension_numbers = #tpu.dot_dimension_numbers<[2], [2], [1], [1], [0, 0, 0, 1, 1, 1], [0], [0]>} : vector<8x32x4xf32>, vector<8x8x4xf32>, vector<8x32x8xf32> -> vector<8x32x8xf32>
    "tpu.trace_stop"() : () -> ()
    %cst_113 = arith.constant dense<0xFF800000> : vector<8x32xf32>
    %172 = vector.multi_reduction <maximumf>, %171, %cst_113 [2] : vector<8x32x8xf32> to vector<8x32xf32>
    %173 = vector.shape_cast %172 : vector<8x32xf32> to vector<8x32x1xf32>
    %174 = vector.broadcast %173 : vector<8x32x1xf32> to vector<8x32x8xf32>
    %175 = arith.subf %171, %174 : vector<8x32x8xf32>
    %176 = math.exp %175 : vector<8x32x8xf32>
    %cst_114 = arith.constant dense<0.000000e+00> : vector<8x32xf32>
    %177 = vector.multi_reduction <add>, %176, %cst_114 [2] : vector<8x32x8xf32> to vector<8x32xf32>
    %178 = vector.shape_cast %177 : vector<8x32xf32> to vector<8x32x1xf32>
    %179 = tpu.reciprocal %178 {approx = true} : vector<8x32x1xf32> -> vector<8x32x1xf32>
    %180 = vector.broadcast %179 : vector<8x32x1xf32> to vector<8x32x8xf32>
    %181 = arith.mulf %176, %180 : vector<8x32x8xf32>
    "tpu.trace_start"() <{level = 10 : i32, message = "hqk,hkd->hqd"}> : () -> ()
    %cst_115 = arith.constant dense<0.000000e+00> : vector<8x32x4xf32>
    %182 = tpu.matmul %181, %170, %cst_115 {dimension_numbers = #tpu.dot_dimension_numbers<[2], [1], [1], [2], [0, 0, 0, 1, 1, 2], [0], [0]>} : vector<8x32x8xf32>, vector<8x8x4xf32>, vector<8x32x4xf32> -> vector<8x32x4xf32>
    "tpu.trace_stop"() : () -> ()
    %183 = vector.extract_strided_slice %182 {offsets = [0, 0, 0], sizes = [1, 32, 4], strides = [1, 1, 1]} : vector<8x32x4xf32> to vector<1x32x4xf32>
    %184 = vector.shape_cast %183 : vector<1x32x4xf32> to vector<32x4xf32>
    %c0_116 = arith.constant 0 : index
    %c0_117 = arith.constant 0 : index
    %185 = vector.load %arg11[%c0_116, %c0_117] : memref<32x32xf32, #tpu.memory_space<vmem>>, vector<32x4xf32>
    tpu.vector_store %arg11[%c0_116, %c0_117], %184 {strides = array<i32>} : memref<32x32xf32, #tpu.memory_space<vmem>>, vector<32x4xf32>,
    %186 = vector.extract_strided_slice %182 {offsets = [1, 0, 0], sizes = [1, 32, 4], strides = [1, 1, 1]} : vector<8x32x4xf32> to vector<1x32x4xf32>
    %187 = vector.shape_cast %186 : vector<1x32x4xf32> to vector<32x4xf32>
    %c0_118 = arith.constant 0 : index
    %c4_119 = arith.constant 4 : index
    %188 = vector.load %arg11[%c0_118, %c4_119] : memref<32x32xf32, #tpu.memory_space<vmem>>, vector<32x4xf32>
    tpu.vector_store %arg11[%c0_118, %c4_119], %187 {strides = array<i32>} : memref<32x32xf32, #tpu.memory_space<vmem>>, vector<32x4xf32>,
    %189 = vector.extract_strided_slice %182 {offsets = [2, 0, 0], sizes = [1, 32, 4], strides = [1, 1, 1]} : vector<8x32x4xf32> to vector<1x32x4xf32>
    %190 = vector.shape_cast %189 : vector<1x32x4xf32> to vector<32x4xf32>
    %c0_120 = arith.constant 0 : index
    %c8 = arith.constant 8 : index
    %191 = vector.load %arg11[%c0_120, %c8] : memref<32x32xf32, #tpu.memory_space<vmem>>, vector<32x4xf32>
    tpu.vector_store %arg11[%c0_120, %c8], %190 {strides = array<i32>} : memref<32x32xf32, #tpu.memory_space<vmem>>, vector<32x4xf32>,
    %192 = vector.extract_strided_slice %182 {offsets = [3, 0, 0], sizes = [1, 32, 4], strides = [1, 1, 1]} : vector<8x32x4xf32> to vector<1x32x4xf32>
    %193 = vector.shape_cast %192 : vector<1x32x4xf32> to vector<32x4xf32>
    %c0_121 = arith.constant 0 : index
    %c12 = arith.constant 12 : index
    %194 = vector.load %arg11[%c0_121, %c12] : memref<32x32xf32, #tpu.memory_space<vmem>>, vector<32x4xf32>
    tpu.vector_store %arg11[%c0_121, %c12], %193 {strides = array<i32>} : memref<32x32xf32, #tpu.memory_space<vmem>>, vector<32x4xf32>,
    %195 = vector.extract_strided_slice %182 {offsets = [4, 0, 0], sizes = [1, 32, 4], strides = [1, 1, 1]} : vector<8x32x4xf32> to vector<1x32x4xf32>
    %196 = vector.shape_cast %195 : vector<1x32x4xf32> to vector<32x4xf32>
    %c0_122 = arith.constant 0 : index
    %c16 = arith.constant 16 : index
    %197 = vector.load %arg11[%c0_122, %c16] : memref<32x32xf32, #tpu.memory_space<vmem>>, vector<32x4xf32>
    tpu.vector_store %arg11[%c0_122, %c16], %196 {strides = array<i32>} : memref<32x32xf32, #tpu.memory_space<vmem>>, vector<32x4xf32>,
    %198 = vector.extract_strided_slice %182 {offsets = [5, 0, 0], sizes = [1, 32, 4], strides = [1, 1, 1]} : vector<8x32x4xf32> to vector<1x32x4xf32>
    %199 = vector.shape_cast %198 : vector<1x32x4xf32> to vector<32x4xf32>
    %c0_123 = arith.constant 0 : index
    %c20 = arith.constant 20 : index
    %200 = vector.load %arg11[%c0_123, %c20] : memref<32x32xf32, #tpu.memory_space<vmem>>, vector<32x4xf32>
    tpu.vector_store %arg11[%c0_123, %c20], %199 {strides = array<i32>} : memref<32x32xf32, #tpu.memory_space<vmem>>, vector<32x4xf32>,
    %201 = vector.extract_strided_slice %182 {offsets = [6, 0, 0], sizes = [1, 32, 4], strides = [1, 1, 1]} : vector<8x32x4xf32> to vector<1x32x4xf32>
    %202 = vector.shape_cast %201 : vector<1x32x4xf32> to vector<32x4xf32>
    %c0_124 = arith.constant 0 : index
    %c24 = arith.constant 24 : index
    %203 = vector.load %arg11[%c0_124, %c24] : memref<32x32xf32, #tpu.memory_space<vmem>>, vector<32x4xf32>
    tpu.vector_store %arg11[%c0_124, %c24], %202 {strides = array<i32>} : memref<32x32xf32, #tpu.memory_space<vmem>>, vector<32x4xf32>,
    %204 = vector.extract_strided_slice %182 {offsets = [7, 0, 0], sizes = [1, 32, 4], strides = [1, 1, 1]} : vector<8x32x4xf32> to vector<1x32x4xf32>
    %205 = vector.shape_cast %204 : vector<1x32x4xf32> to vector<32x4xf32>
    %c0_125 = arith.constant 0 : index
    %c28 = arith.constant 28 : index
    %206 = vector.load %arg11[%c0_125, %c28] : memref<32x32xf32, #tpu.memory_space<vmem>>, vector<32x4xf32>
    tpu.vector_store %arg11[%c0_125, %c28], %205 {strides = array<i32>} : memref<32x32xf32, #tpu.memory_space<vmem>>, vector<32x4xf32>,
    %c0_126 = arith.constant 0 : index
    %c0_127 = arith.constant 0 : index
    %207 = vector.load %arg11[%c0_126, %c0_127] : memref<32x32xf32, #tpu.memory_space<vmem>>, vector<32x32xf32>
    %c0_128 = arith.constant 0 : index
    %c96 = arith.constant 96 : index
    %208 = vector.load %arg5[%c0_128, %c96] : memref<32x128xf32, #tpu.memory_space<vmem>>, vector<32x32xf32>
    %cst_129 = arith.constant dense<0.000000e+00> : vector<32x32xf32>
    %209 = tpu.matmul %207, %208, %cst_129 {dimension_numbers = #tpu.dot_dimension_numbers<[1], [0], [0], [1], [0, 0, 1, 1], [], []>} : vector<32x32xf32>, vector<32x32xf32>, vector<32x32xf32> -> vector<32x32xf32>
    %c8_130 = arith.constant 8 : index
    %c0_131 = arith.constant 0 : index
    %210 = vector.load %arg6[%c8_130, %c0_131] : memref<10x32xf32, #tpu.memory_space<vmem>>, vector<1x32xf32>
    %211 = vector.broadcast %210 : vector<1x32xf32> to vector<32x32xf32>
    %212 = arith.addf %209, %211 : vector<32x32xf32>
    %c9 = arith.constant 9 : index
    %c0_132 = arith.constant 0 : index
    %213 = vector.load %arg6[%c9, %c0_132] : memref<10x32xf32, #tpu.memory_space<vmem>>, vector<1x32xf32>
    %214 = vector.broadcast %213 : vector<1x32xf32> to vector<32x32xf32>
    %215 = arith.mulf %214, %212 : vector<32x32xf32>
    %216 = arith.addf %56, %215 : vector<32x32xf32>
    %c0_133 = arith.constant 0 : index
    %c0_134 = arith.constant 0 : index
    %c0_135 = arith.constant 0 : index
    %217 = vector.load %arg7[%c0_133, %c0_134, %c0_135] : memref<1x32x32xf32, #tpu.memory_space<vmem>>, vector<1x32x32xf32>
    %218 = vector.shape_cast %217 : vector<1x32x32xf32> to vector<32x32xf32>
    %219 = vector.shape_cast %216 : vector<32x32xf32> to vector<1x32x32xf32>
    tpu.vector_store %arg7[%c0_133, %c0_134, %c0_135], %219 {strides = array<i32>} : memref<1x32x32xf32, #tpu.memory_space<vmem>>, vector<1x32x32xf32>,
    return
  }
  func.func @transform_0(%arg0: i32, %arg1: i32) -> (i32, i32, i32) {
    %c0_i32 = arith.constant 0 : i32
    %c0_i32_0 = arith.constant 0 : i32
    return %arg0, %arg1, %c0_i32 : i32, i32, i32
  }
  func.func @transform_1(%arg0: i32, %arg1: i32) -> (i32, i32, i32) {
    %c0_i32 = arith.constant 0 : i32
    %c0_i32_0 = arith.constant 0 : i32
    %c0_i32_1 = arith.constant 0 : i32
    return %arg0, %c0_i32, %c0_i32_0 : i32, i32, i32
  }
  func.func @transform_2(%arg0: i32, %arg1: i32) -> (i32, i32) {
    %c0_i32 = arith.constant 0 : i32
    %c0_i32_0 = arith.constant 0 : i32
    %c0_i32_1 = arith.constant 0 : i32
    return %c0_i32, %c0_i32_0 : i32, i32
  }
  func.func @transform_3(%arg0: i32, %arg1: i32) -> (i32, i32) {
    %c0_i32 = arith.constant 0 : i32
    %c0_i32_0 = arith.constant 0 : i32
    %c0_i32_1 = arith.constant 0 : i32
    return %c0_i32, %c0_i32_0 : i32, i32
  }
  func.func @transform_4(%arg0: i32, %arg1: i32) -> (i32, i32) {
    %c0_i32 = arith.constant 0 : i32
    %c0_i32_0 = arith.constant 0 : i32
    %c0_i32_1 = arith.constant 0 : i32
    return %c0_i32, %c0_i32_0 : i32, i32
  }
  func.func @transform_5(%arg0: i32, %arg1: i32) -> (i32, i32, i32) {
    %c0_i32 = arith.constant 0 : i32
    %c0_i32_0 = arith.constant 0 : i32
    return %arg0, %arg1, %c0_i32 : i32, i32, i32
  }
}

</mosaic_0001>

<bundles_post_ra>
// kernel: tpu_custom_call.1
= control target key start
LH: loop header
LB: loop body
LE: loop exit
PB: predicated region body
PF: predicated region fallthrough
CT: control target
= control target key end

     0   :  { %s3951_s18 = smov 0   ;;  %s3953_s19 = smov 0   ;;  %s4673_s0 = inlined_call_operand.vmem [shape: f32[2,64,32], index: 0, kind: input, shape index: {}]   ;;  %s4674_s1 = inlined_call_operand.vmem [shape: f32[2,8,48], index: 1, kind: input, shape index: {}]   ;;  %s4675_s2 = inlined_call_operand.vmem [shape: f32[48,32], index: 2, kind: input, shape index: {}]   ;;  %s4676_s3 = inlined_call_operand.vmem [shape: f32[32,128], index: 3, kind: input, shape index: {}]   ;;  %s4677_s4 = inlined_call_operand.vmem [shape: f32[10,32], index: 4, kind: input, shape index: {}]   ;;  %s4678_s5 = inlined_call_operand.vmem [shape: f32[2,64,32], index: 5, kind: output, shape index: {}]  }
   0x1   :  { %s3955_s20 = smov 0   ;;  %s3957_s21 = smov 0  }
   0x2   :  { %s3959_s22 = smov 0  }
   0x3 LB: > { %s24_s23 = sadd.s32 1, %s3886_s20  ;;  %s27_s24 = sadd.s32 1, %s3890_s21  ;;  %s3894_s22 = sphi %s3959_s22, %s15_s22   ;;  %s3890_s21 = sphi %s3957_s21, %s4682_s21   ;;  %s3886_s20 = sphi %s3955_s20, %s4681_s20   ;;  %s3882_s19 = sphi %s3953_s19, %s4680_s19   ;;  %s3878_s18 = sphi %s3951_s18, %s4679_s18  }
   0x4   : > { %p25_p0 = scmp.ge.s32.totalorder %s24_s23, 2  ;;  %p3261_p1 = scmp.ge.s32.totalorder %s3894_s22, 1 }
   0x5   : > { %p217_p2 = scmp.lt.s32.totalorder %s3894_s22, 5 }
   0x6   : > { %s4684_s23 = smov (%p25_p0, %s24_s23), 0  ;;  %s4686_s24 = smov (!%p25_p0, %s27_s24), %s3890_s21 }
   0x7   : > { %p218_p3 = pnand %p3261_p1, %p217_p2  ;;  %p29_p4 = scmp.ge.s32.totalorder %s4686_s24, 2 }
   0x8   : > { %s3262_s27 = sshll.u32 (!%p218_p3), %s3878_s18, 2  ;;  %p258_p5 = scmp.lt.s32.totalorder (!%p218_p3), %s3882_s19, 1 }
   0x9   : > { %s4688_s24 = smov (%p29_p4, %s4686_s24), 0  ;;  %221 = sbr.rel (%p218_p3) target bundleno = 1986 (0x7c2), region = 40 }
   0xa   : > { %p260_p6 = scmp.lt.s32.totalorder (!%p218_p3), %s3262_s27, 7  ;;  %s3898_s6 = smov (!%p218_p3), 96  }
   0xb   : > { %s3899_s30 = smov (!%p218_p3), 124   ;;  %s3901_s8 = smov (!%p218_p3), 116  }
   0xc   : > { %s3902_s9 = smov (!%p218_p3), 112   ;;  %s3903_s12 = smov (!%p218_p3), 108  }
   0xd   : > { %s3904_s13 = smov (!%p218_p3), 104   ;;  %s3905_s14 = smov (!%p218_p3), 100  }
   0xe   : > { %v291_v0 = vld [vmem:[%s4675_s2 + $0x28] sm:$0xff]  ;;  %v3896_v1 = vmov 0.0   ;;  %v290_v2 = vld [vmem:[%s4675_s2 + $0x20] sm:$0xff]  ;;  %s4690_s19 = smov (!%p258_p5, %s3882_s19), 1  ;;  %vm3897_vm0 = vmmov 0   ;;  %v289_v3 = vld [vmem:[%s4675_s2 + $0x18] sm:$0xff] }
   0xf   : > { %3471 = vmatprep.subr.mxu0 %v3896_v1  ;;  %3483 = vmatprep.mubr.msk.f32.mxu0 %vm3897_vm0, %v3896_v1  ;;  %s4692_s27 = smov (!%p260_p6, %s3262_s27), 7  ;;  %s3263_s7 = sshll.u32 %s4690_s19, 3  ;;  %v288_v4 = vld [vmem:[%s4675_s2 + $0x10] sm:$0xff]  ;;  %vm373_vm1 = vcmask 261120   ;;  %v287_v5 = vld [vmem:[%s4675_s2 + $0x8] sm:$0xff]  ;;  %v286_v10 = vld [vmem:[%s4675_s2] sm:$0xff] }
  0x10   : > { %3472 = vmatpush3.msra.mxu0 %v291_v0  ;;  %s4001_s10 = sadd.s32 %s3263_s7, %s4692_s27  ;;  %s270_s19 = scalar_lea.vmem %s4674_s1, %s3263_s7  ;;  %vm297_vm2 = vcmask 392192   ;;  %v471_v26 = vld [vmem:[%s4676_s3 + $0x18] sm:$0xff]  ;;  %v470_v27 = vld [vmem:[%s4676_s3 + $0x10] sm:$0xff]  ;;  %v469_v28 = vld [vmem:[%s4676_s3 + $0x8] sm:$0xff]  ;;  %vm679_vm3 = vcmask 31744   ;;  %vm1732_vm4 = vcmask 64512  }
  0x11   : > { %3473 = vmatprep.subr.mxu0 %v3896_v1  ;;  %s3264_s11 = sshll.u32 %s4001_s10, 3  ;;  %v285_v13 = vld [vmem:[%s270_s19] sm:$0xff]  ;;  %3486 = vmatprep.subr.mxu1 %v471_v26  ;;  %s3900_s7 = smov 120   ;;  %vm2881_vm5 = vcmask 64544   ;;  %vm2902_vm6 = vcmask 97344   ;;  %vm2923_vm7 = vcmask 130144  }
  0x12   : > { %3474 = vmatpush3.msra.mxu0 %v290_v2  ;;  %s265_s16 = scalar_lea.vmem %s4673_s0, %s3264_s11  ;;  %3487 = vmatpush3.msra.mxu1 %v471_v26  ;;  %v3269_v34 = vld [vmem:[%s4677_s4] ss:$0 sm:$0xff]  ;;  %v3273_v49 = vld [vmem:[%s4677_s4 + $0x1] ss:$0 sm:$0xff]  ;;  %v3274_v51 = vld [vmem:[%s4677_s4 + $0x2] ss:$0 sm:$0xff] }
  0x13   : > { %3475 = vmatprep.subr.mxu0 %v3896_v1  ;;  %v281_v6 = vld [vmem:[%s265_s16] sm:$0xff]  ;;  %v283_v7 = vld [vmem:[%s265_s16 + $0x10] sm:$0xff]  ;;  %v282_v8 = vld [vmem:[%s265_s16 + $0x8] sm:$0xff]  ;;  %3488 = vmatprep.subr.mxu1 %v470_v27  ;;  %s3906_s17 = smov 32   ;;  %s3907_s25 = smov 92   ;;  %vm2944_vm8 = vcmask 162944  }
  0x14   : > { %3476 = vmatpush3.msra.mxu0 %v289_v3  ;;  %v400_v9 = vsel %vm373_vm1, %v281_v6, 0.0  ;;  %v406_v11 = vsel %vm373_vm1, %v283_v7, 0.0  ;;  %v284_v12 = vld [vmem:[%s265_s16 + $0x18] sm:$0xff]  ;;  %v403_v14 = vsel %vm373_vm1, %v282_v8, 0.0  ;;  %3489 = vmatpush3.msra.mxu1 %v470_v27  ;;  %v468_v44 = vld [vmem:[%s4676_s3] sm:$0xff]  ;;  %s3908_s26 = smov 88  }
  0x15   : > { %3477 = vmatprep.subr.mxu0 %v3896_v1  ;;  %401 = vadd.xlane.f32.xlu0 %v400_v9  ;;  %v409_v15 = vsel %vm373_vm1, %v284_v12, 0.0  ;;  %s3909_s27 = smov 84   ;;  %s3910_s28 = smov 80   ;;  %vm2965_vm9 = vcmask 195744   ;;  %vm2986_vm10 = vcmask 228544   ;;  %vm3007_vm11 = vcmask 261344  }
  0x16   : > { %3478 = vmatpush3.msra.mxu0 %v288_v4  ;;  %407 = vadd.xlane.f32.xlu1 %v406_v11  ;;  %s3912_s29 = smov 76   ;;  %s3916_s15 = smov 16  }
  0x17   : > { %3479 = vmatprep.subr.mxu0 %v3896_v1  ;;  %3490 = vmatprep.subr.mxu1 %v469_v28  ;;  %s3917_s16 = smov 12   ;;  %s3918_s18 = smov 20  }
  0x18   : > { %3480 = vmatpush3.msra.mxu0 %v287_v5  ;;  %3491 = vmatpush3.msra.mxu1 %v469_v28  ;;  %s3919_s19 = smov 24  }
  0x19   : > { %3481 = vmatprep.subr.mxu0 %v3896_v1  ;;  %404 = vadd.xlane.f32.xlu0 %v403_v14 }
  0x1a   : > { %3482 = vmatpush3.msra.mxu0 %v286_v10  ;;  %410 = vadd.xlane.f32.xlu1 %v409_v15 }
  0x1b   : > { %3484 = vmatmul.mubr.msk.f32.vlgmr.msra.gmra.mxu0 %vm297_vm2, %v285_v13  ;;  %3492 = vmatprep.subr.mxu1 %v468_v44 }
  0x1c   : > { %3493 = vmatpush3.msra.mxu1 %v468_v44 }
  0x1d   : > { %3500 = vmatprep.subr.mxu1 %v3896_v1 }
  0x9e   : > { %v402_v16 = vpop.xlane.xlu0 %401 }
  0x9f   : > { %v412_v17 = vmul.f32 0.03125, %v402_v16  ;;  %v408_v18 = vpop.xlane.xlu1 %407 }
  0xa0   : > { %v414_v19 = vmul.f32 0.03125, %v408_v18 }
  0xa1   : > { %v416_v20 = vsub.f32 %v281_v6, %v412_v17 }
  0xa2   : > { %v4025_v21 = vsub.f32 %v283_v7, %v414_v19  ;;  %v405_v29 = vpop.xlane.xlu0 %404 }
  0xa3   : > { %v420_v22 = vmul.f32 %v416_v20, %v416_v20  ;;  %v413_v30 = vmul.f32 0.03125, %v405_v29  ;;  %v411_v31 = vpop.xlane.xlu1 %410 }
  0xa4   : > { %v422_v23 = vmul.f32 %v4025_v21, %v4025_v21  ;;  %v415_v33 = vmul.f32 0.03125, %v411_v31 }
  0xa5   : > { %v424_v24 = vsel %vm373_vm1, %v420_v22, 0.0  ;;  %v417_v32 = vsub.f32 %v282_v8, %v413_v30 }
  0xa6   : > { %425 = vadd.xlane.f32.xlu1 %v424_v24  ;;  %v430_v25 = vsel %vm373_vm1, %v422_v23, 0.0  ;;  %v419_v37 = vsub.f32 %v284_v12, %v415_v33 }
  0xa7   : > { %v421_v38 = vmul.f32 %v417_v32, %v417_v32 }
  0xa8   : > { %v423_v42 = vmul.f32 %v419_v37, %v419_v37 }
  0xa9   : > { %v427_v41 = vsel %vm373_vm1, %v421_v38, 0.0 }
  0xaa   : > { %431 = vadd.xlane.f32.xlu1 %v430_v25  ;;  %v433_v43 = vsel %vm373_vm1, %v423_v42, 0.0  ;;  %v3271_v25 = vld [vmem:[%s4677_s4 + $0x3] ss:$0 sm:$0xff] }
  0xbb   : > { %582 = vrot.lane.b32.xlu1 %v470_v27, %s3898_s6  ;;  %v3272_v27 = vld [vmem:[%s4677_s4 + $0x4] ss:$0 sm:$0xff] }
  0xbf   : > { %580 = vrot.lane.b32.xlu1 %v469_v28, %s3898_s6 }
  0xdb   : > { %v367_v35 = vpop.f32.mrf.mxu0 }
  0xdc   : > { %v368_v36 = vadd.f32 %v3269_v34, %v367_v35 }
  0xdd   : > { %v3485_v39 = vpop.f32.mrf.mxu0 }
  0xde   : > { %v374_v40 = vsel %vm373_vm1, %v368_v36, 0.0  ;;  %v3282_v39 = vld [vmem:[%s4677_s4 + $0x7] ss:$0 sm:$0xff] }
  0xdf   : > { %375 = vadd.xlane.f32.xlu0 %v374_v40 }
  0xe3   : > { %428 = vadd.xlane.f32.xlu0 %v427_v41 }
  0xe7   : > { %434 = vadd.xlane.f32.xlu0 %v433_v43 }
  0xfd   : > { %584 = vrot.lane.b32.xlu0 %v471_v26, %s3898_s6 }
 0x12f   : > { %v426_v45 = vpop.xlane.xlu1 %425 }
 0x130   : > { %v436_v46 = vmul.f32 0.03125, %v426_v45 }
 0x132   : > { %v440_v47 = vadd.f32 1e-05, %v436_v46 }
 0x133   : > { %v432_v54 = vpop.xlane.xlu1 %431 }
 0x134   : > { %3718 = vrsqrt.f32 %v440_v47  ;;  %v438_v55 = vmul.f32 0.03125, %v432_v54  ;;  %v3281_v54 = vld [vmem:[%s4677_s4 + $0x6] ss:$0 sm:$0xff] }
 0x136   : > { %v442_v56 = vadd.f32 1e-05, %v438_v55 }
 0x137   : > { %v583_v11 = vpop.permute.xlu1 %582 }
 0x138   : > { %3720 = vrsqrt.f32 %v442_v56 }
 0x13b   : > { %v581_v19 = vpop.permute.xlu1 %580 }
 0x141   : > { %v3719_v48 = vpop.eup %3718 }
 0x142   : > { %v448_v50 = vmul.f32 %v3719_v48, %v416_v20 }
 0x144   : > { %v456_v52 = vmul.f32 %v3273_v49, %v448_v50 }
 0x145   : > { %v3721_v5 = vpop.eup %3720 }
 0x146   : > { %v4059_v53 = vadd.f32 %v3274_v51, %v456_v52  ;;  %v450_v6 = vmul.f32 %v3721_v5, %v4025_v21 }
 0x148   : > { %3494 = vmatprep.mubr.msk.f32.mxu1 %vm373_vm1, %v4059_v53  ;;  %v458_v9 = vmul.f32 %v3273_v49, %v450_v6 }
 0x14a   : > { %v4068_v16 = vadd.f32 %v3274_v51, %v458_v9 }
 0x168   : > { %v376_v57 = vpop.xlane.xlu0 %375 }
 0x169   : > { %v378_v58 = vmul.f32 0.03125, %v376_v57 }
 0x16b   : > { %v379_v59 = vsub.f32 %v368_v36, %v378_v58 }
 0x16c   : > { %v429_v60 = vpop.xlane.xlu0 %428 }
 0x16d   : > { %v437_v61 = vmul.f32 0.03125, %v429_v60  ;;  %v380_v62 = vmul.f32 %v379_v59, %v379_v59 }
 0x16f   : > { %v441_v63 = vadd.f32 1e-05, %v437_v61  ;;  %v381_v0 = vsel %vm373_vm1, %v380_v62, 0.0 }
 0x170   : > { %382 = vadd.xlane.f32.xlu1 %v381_v0  ;;  %v435_v2 = vpop.xlane.xlu0 %434 }
 0x171   : > { %3722 = vrsqrt.f32 %v441_v63  ;;  %v439_v3 = vmul.f32 0.03125, %v435_v2 }
 0x173   : > { %v443_v4 = vadd.f32 1e-05, %v439_v3 }
 0x174   : > { %v585_v15 = vpop.permute.xlu0 %584 }
 0x175   : > { %3724 = vrsqrt.f32 %v443_v4 }
 0x17e   : > { %v3723_v7 = vpop.eup %3722 }
 0x17f   : > { %v449_v8 = vmul.f32 %v3723_v7, %v417_v32 }
 0x181   : > { %v457_v10 = vmul.f32 %v3273_v49, %v449_v8  ;;  %578 = vrot.lane.b32.xlu1 %v468_v44, %s3898_s6 }
 0x182   : > { %v3725_v12 = vpop.eup %3724 }
 0x183   : > { %v4066_v13 = vadd.f32 %v3274_v51, %v457_v10  ;;  %v451_v14 = vmul.f32 %v3725_v12, %v419_v37 }
 0x185   : > { %3495 = vmatmul.mubr.msk.f32.vlgmr.msra.gmra.mxu1 %vm373_vm1, %v4066_v13  ;;  %v459_v17 = vmul.f32 %v3273_v49, %v451_v14 }
 0x186   : > { %3497 = vmatprep.mubr.msk.f32.mxu1 %vm373_vm1, %v4068_v16  ;;  %3501 = vmatpush3.msra.mxu1 %v585_v15 }
 0x187   : > { %v4074_v18 = vadd.f32 %v3274_v51, %v459_v17  ;;  %3502 = vmatprep.subr.mxu1 %v3896_v1 }
 0x188   : > { %3503 = vmatpush3.msra.mxu1 %v583_v11 }
 0x189   : > { %3498 = vmatmul.mubr.msk.f32.gmra.mxu1 %vm373_vm1, %v4074_v18  ;;  %3504 = vmatprep.subr.mxu1 %v3896_v1 }
 0x18a   : > { %3505 = vmatpush3.msra.mxu1 %v581_v19  ;;  %3508 = vmatprep.mubr.msk.f32.mxu1 %vm3897_vm0, %v3896_v1 }
 0x18b   : > { %3506 = vmatprep.subr.mxu1 %v3896_v1  ;;  %v3275_v1 = vld [vmem:[%s4677_s4 + $0x5] ss:$0 sm:$0xff] }
 0x1f9   : > { %v383_v20 = vpop.xlane.xlu1 %382 }
 0x1fa   : > { %v384_v21 = vmul.f32 0.03125, %v383_v20 }
 0x1fc   : > { %v385_v22 = vadd.f32 1e-05, %v384_v21 }
 0x1fd   : > { %v579_v23 = vpop.permute.xlu1 %578 }
 0x1fe   : > { %3726 = vrsqrt.f32 %v385_v22  ;;  %3507 = vmatpush3.msra.mxu1 %v579_v23 }
 0x20b   : > { %v3727_v24 = vpop.eup %3726 }
 0x20c   : > { %v387_v26 = vmul.f32 %v3727_v24, %v379_v59 }
 0x20e   : > { %v392_v28 = vmul.f32 %v3271_v25, %v387_v26 }
 0x210   : > { %v397_v29 = vadd.f32 %v3272_v27, %v392_v28 }
 0x212   : > { %3509 = vmatmul.mubr.msk.f32.vlgmr.msra.gmra.mxu1 %vm373_vm1, %v397_v29 }
 0x245   : > { %v3496_v30 = vpop.f32.mrf.mxu1 }
 0x246   : > { %v561_v31 = vadd.f32 %v3496_v30, %v3275_v1 }
 0x247   : > { %v555_v32 = vpop.f32.mrf.mxu1 }
 0x248   : > { %681 = vst.msk [vmem:[#allocation2 + $0x8] sm:$0xff] %vm679_vm3, %v561_v31  ;;  %v556_v33 = vadd.f32 %v3275_v1, %v555_v32  ;;  %696 = vrot.lane.b32.xlu0 %v561_v31, %s3899_s30 }
 0x249   : > { %v3499_v34 = vpop.f32.mrf.mxu1 }
 0x24a   : > { %680 = vst.msk [vmem:[#allocation2] sm:$0xff] %vm679_vm3, %v556_v33  ;;  %v4096_v35 = vadd.f32 %v3499_v34, %v3275_v1  ;;  %694 = vrot.lane.b32.xlu1 %v556_v33, %s3899_s30 }
 0x24b   : > { %v565_v36 = vpop.f32.mrf.mxu1 }
 0x24c   : > { %683 = vst.msk [vmem:[#allocation2 + $0x18] sm:$0xff] %vm679_vm3, %v4096_v35  ;;  %v566_v37 = vadd.f32 %v3275_v1, %v565_v36  ;;  %724 = vrot.lane.b32.xlu0 %v561_v31, %s3900_s7 }
 0x24e   : > { %682 = vst.msk [vmem:[#allocation2 + $0x10] sm:$0xff] %vm679_vm3, %v566_v37  ;;  %722 = vrot.lane.b32.xlu1 %v556_v33, %s3900_s7 }
 0x24f   : > { %v885_v3 = vld [vmem:[#allocation2 + $0x8] sm:$0xff] }
 0x250   : > { %751 = vrot.lane.b32.xlu0 %v561_v31, %s3901_s8 }
 0x251   : > { %v884_v38 = vld [vmem:[#allocation2] sm:$0xff] }
 0x252   : > { %749 = vrot.lane.b32.xlu1 %v556_v33, %s3901_s8  ;;  %3513 = vmatprep.mubr.msk.f32.mxu0 %vm679_vm3, %v884_v38 }
 0x253   : > { %v887_v6 = vld [vmem:[#allocation2 + $0x18] sm:$0xff] }
 0x254   : > { %778 = vrot.lane.b32.xlu0 %v561_v31, %s3902_s9 }
 0x255   : > { %v886_v4 = vld [vmem:[#allocation2 + $0x10] sm:$0xff] }
 0x256   : > { %776 = vrot.lane.b32.xlu1 %v556_v33, %s3902_s9 }
 0x258   : > { %805 = vrot.lane.b32.xlu0 %v561_v31, %s3903_s12 }
 0x25a   : > { %803 = vrot.lane.b32.xlu1 %v556_v33, %s3903_s12 }
 0x25c   : > { %832 = vrot.lane.b32.xlu0 %v561_v31, %s3904_s13 }
 0x25e   : > { %830 = vrot.lane.b32.xlu1 %v556_v33, %s3904_s13 }
 0x260   : > { %859 = vrot.lane.b32.xlu0 %v561_v31, %s3905_s14 }
 0x262   : > { %857 = vrot.lane.b32.xlu1 %v556_v33, %s3905_s14 }
 0x264   : > { %728 = vrot.lane.b32.xlu0 %v4096_v35, %s3900_s7 }
 0x266   : > { %700 = vrot.lane.b32.xlu1 %v4096_v35, %s3899_s30 }
 0x268   : > { %782 = vrot.lane.b32.xlu0 %v4096_v35, %s3902_s9 }
 0x26a   : > { %755 = vrot.lane.b32.xlu1 %v4096_v35, %s3901_s8 }
 0x26e   : > { %809 = vrot.lane.b32.xlu1 %v4096_v35, %s3903_s12 }
 0x272   : > { %698 = vrot.lane.b32.xlu1 %v566_v37, %s3899_s30 }
 0x276   : > { %726 = vrot.lane.b32.xlu1 %v566_v37, %s3900_s7 }
 0x27a   : > { %753 = vrot.lane.b32.xlu1 %v566_v37, %s3901_s8 }
 0x27e   : > { %780 = vrot.lane.b32.xlu1 %v566_v37, %s3902_s9 }
 0x282   : > { %807 = vrot.lane.b32.xlu1 %v566_v37, %s3903_s12 }
 0x286   : > { %834 = vrot.lane.b32.xlu1 %v566_v37, %s3904_s13 }
 0x28a   : > { %861 = vrot.lane.b32.xlu1 %v566_v37, %s3905_s14 }
 0x28e   : > { %675 = vrot.lane.b32.xlu1 %v3282_v39, %s3906_s17 }
 0x2ba   : > { %v697_v40 = vpop.permute.xlu0 %696 }
 0x2bb   : > { %708 = vst.msk [vmem:[#allocation2 + $0x28] sm:$0xff] %vm679_vm3, %v697_v40 }
 0x2bc   : > { %v695_v41 = vpop.permute.xlu1 %694 }
 0x2bd   : > { %707 = vst.msk [vmem:[#allocation2 + $0x20] sm:$0xff] %vm679_vm3, %v695_v41 }
 0x2be   : > { %v725_v42 = vpop.permute.xlu0 %724 }
 0x2bf   : > { %736 = vst.msk [vmem:[#allocation2 + $0x48] sm:$0xff] %vm679_vm3, %v725_v42 }
 0x2c0   : > { %v723_v43 = vpop.permute.xlu1 %722 }
 0x2c1   : > { %735 = vst.msk [vmem:[#allocation2 + $0x40] sm:$0xff] %vm679_vm3, %v723_v43 }
 0x2c2   : > { %v752_v44 = vpop.permute.xlu0 %751  ;;  %v889_v24 = vld [vmem:[#allocation2 + $0x28] sm:$0xff] }
 0x2c3   : > { %763 = vst.msk [vmem:[#allocation2 + $0x68] sm:$0xff] %vm679_vm3, %v752_v44 }
 0x2c4   : > { %v750_v45 = vpop.permute.xlu1 %749  ;;  %v888_v46 = vld [vmem:[#allocation2 + $0x20] sm:$0xff] }
 0x2c5   : > { %762 = vst.msk [vmem:[#allocation2 + $0x60] sm:$0xff] %vm679_vm3, %v750_v45  ;;  %3521 = vmatprep.mubr.msk.f32.mxu1 %vm679_vm3, %v888_v46 }
 0x2c6   : > { %v779_v47 = vpop.permute.xlu0 %778  ;;  %v893_v29 = vld [vmem:[#allocation2 + $0x48] sm:$0xff] }
 0x2c7   : > { %790 = vst.msk [vmem:[#allocation2 + $0x88] sm:$0xff] %vm679_vm3, %v779_v47 }
 0x2c8   : > { %v777_v48 = vpop.permute.xlu1 %776  ;;  %v892_v7 = vld [vmem:[#allocation2 + $0x40] sm:$0xff] }
 0x2c9   : > { %789 = vst.msk [vmem:[#allocation2 + $0x80] sm:$0xff] %vm679_vm3, %v777_v48 }
 0x2ca   : > { %v806_v49 = vpop.permute.xlu0 %805 }
 0x2cb   : > { %817 = vst.msk [vmem:[#allocation2 + $0xa8] sm:$0xff] %vm679_vm3, %v806_v49 }
 0x2cc   : > { %v804_v50 = vpop.permute.xlu1 %803  ;;  %v896_v31 = vld [vmem:[#allocation2 + $0x60] sm:$0xff] }
 0x2cd   : > { %816 = vst.msk [vmem:[#allocation2 + $0xa0] sm:$0xff] %vm679_vm3, %v804_v50 }
 0x2ce   : > { %v833_v51 = vpop.permute.xlu0 %832  ;;  %v901_v39 = vld [vmem:[#allocation2 + $0x88] sm:$0xff] }
 0x2cf   : > { %844 = vst.msk [vmem:[#allocation2 + $0xc8] sm:$0xff] %vm679_vm3, %v833_v51 }
 0x2d0   : > { %v831_v52 = vpop.permute.xlu1 %830  ;;  %v900_v37 = vld [vmem:[#allocation2 + $0x80] sm:$0xff] }
 0x2d1   : > { %843 = vst.msk [vmem:[#allocation2 + $0xc0] sm:$0xff] %vm679_vm3, %v831_v52 }
 0x2d2   : > { %v659_v55 = vpop.f32.mrf.mxu1  ;;  %v860_v56 = vpop.permute.xlu0 %859  ;;  %v905_v47 = vld [vmem:[#allocation2 + $0xa8] sm:$0xff] }
 0x2d3   : > { %v668_v57 = vadd.f32 %v3281_v54, %v659_v55  ;;  %871 = vst.msk [vmem:[#allocation2 + $0xe8] sm:$0xff] %vm679_vm3, %v860_v56 }
 0x2d4   : > { %v858_v58 = vpop.permute.xlu1 %857  ;;  %v3510_v59 = vpop.f32.mrf.mxu1  ;;  %v904_v43 = vld [vmem:[#allocation2 + $0xa0] sm:$0xff] }
 0x2d5   : > { %684 = vst.msk [vmem:[#allocation3] sm:$0xff] %vm679_vm3, %v668_v57  ;;  %870 = vst.msk [vmem:[#allocation2 + $0xe0] sm:$0xff] %vm679_vm3, %v858_v58  ;;  %712 = vrot.lane.b32.xlu0 %v668_v57, %s3899_s30  ;;  %s3913_s30 = smov 68  }
 0x2d6   : > { %v729_v60 = vpop.permute.xlu0 %728  ;;  %v909_v51 = vld [vmem:[#allocation2 + $0xc8] sm:$0xff] }
 0x2d7   : > { %738 = vst.msk [vmem:[#allocation2 + $0x58] sm:$0xff] %vm679_vm3, %v729_v60 }
 0x2d8   : > { %v701_v61 = vpop.permute.xlu1 %700  ;;  %v908_v49 = vld [vmem:[#allocation2 + $0xc0] sm:$0xff] }
 0x2d9   : > { %710 = vst.msk [vmem:[#allocation2 + $0x38] sm:$0xff] %vm679_vm3, %v701_v61  ;;  %739 = vrot.lane.b32.xlu0 %v668_v57, %s3900_s7 }
 0x2da   : > { %v783_v62 = vpop.permute.xlu0 %782  ;;  %v913_v58 = vld [vmem:[#allocation2 + $0xe8] sm:$0xff] }
 0x2db   : > { %792 = vst.msk [vmem:[#allocation2 + $0x98] sm:$0xff] %vm679_vm3, %v783_v62 }
 0x2dc   : > { %v756_v63 = vpop.permute.xlu1 %755  ;;  %v916_v0 = vld [vmem:[#allocation3] sm:$0xff] }
 0x2dd   : > { %765 = vst.msk [vmem:[#allocation2 + $0x78] sm:$0xff] %vm679_vm3, %v756_v63  ;;  %766 = vrot.lane.b32.xlu0 %v668_v57, %s3901_s8  ;;  %3511 = vmatprep.subr.msk.mxu0 %vm679_vm3, %v916_v0  ;;  %v912_v56 = vld [vmem:[#allocation2 + $0xe0] sm:$0xff] }
 0x2de   : > { %3512 = vmatpush3.xpose.msk.msra.mxu0 %vm679_vm3, %v916_v0  ;;  %v895_v33 = vld [vmem:[#allocation2 + $0x58] sm:$0xff] }
 0x2e0   : > { %v810_v2 = vpop.permute.xlu1 %809  ;;  %v891_v28 = vld [vmem:[#allocation2 + $0x38] sm:$0xff] }
 0x2e1   : > { %819 = vst.msk [vmem:[#allocation2 + $0xb8] sm:$0xff] %vm679_vm3, %v810_v2  ;;  %793 = vrot.lane.b32.xlu0 %v668_v57, %s3902_s9  ;;  %3514 = vmatmul.mubr.msk.f32.vlgmr.msra.gmra.mxu0 %vm679_vm3, %v885_v3 }
 0x2e2   : > { %3516 = vmatprep.mubr.msk.f32.mxu0 %vm679_vm3, %v886_v4  ;;  %v903_v45 = vld [vmem:[#allocation2 + $0x98] sm:$0xff] }
 0x2e4   : > { %v699_v5 = vpop.permute.xlu1 %698  ;;  %v899_v41 = vld [vmem:[#allocation2 + $0x78] sm:$0xff] }
 0x2e5   : > { %709 = vst.msk [vmem:[#allocation2 + $0x30] sm:$0xff] %vm679_vm3, %v699_v5  ;;  %820 = vrot.lane.b32.xlu0 %v668_v57, %s3903_s12  ;;  %3517 = vmatmul.mubr.msk.f32.gmra.mxu0 %vm679_vm3, %v887_v6  ;;  %s279_s12 = scalar_lea.vmem %s4678_s5, %s3264_s11 }
 0x2e6   : > { %3529 = vmatprep.mubr.msk.f32.mxu0 %vm679_vm3, %v892_v7 }
 0x2e8   : > { %v727_v8 = vpop.permute.xlu1 %726  ;;  %v907_v54 = vld [vmem:[#allocation2 + $0xb8] sm:$0xff] }
 0x2e9   : > { %737 = vst.msk [vmem:[#allocation2 + $0x50] sm:$0xff] %vm679_vm3, %v727_v8  ;;  %847 = vrot.lane.b32.xlu0 %v668_v57, %s3904_s13 }
 0x2ec   : > { %v754_v9 = vpop.permute.xlu1 %753  ;;  %v890_v26 = vld [vmem:[#allocation2 + $0x30] sm:$0xff] }
 0x2ed   : > { %764 = vst.msk [vmem:[#allocation2 + $0x70] sm:$0xff] %vm679_vm3, %v754_v9  ;;  %874 = vrot.lane.b32.xlu0 %v668_v57, %s3905_s14 }
 0x2f0   : > { %v781_v10 = vpop.permute.xlu1 %780  ;;  %v894_v30 = vld [vmem:[#allocation2 + $0x50] sm:$0xff] }
 0x2f1   : > { %791 = vst.msk [vmem:[#allocation2 + $0x90] sm:$0xff] %vm679_vm3, %v781_v10  ;;  %836 = vrot.lane.b32.xlu0 %v4096_v35, %s3904_s13  ;;  %s3914_s13 = smov 4  }
 0x2f4   : > { %v808_v11 = vpop.permute.xlu1 %807  ;;  %v898_v36 = vld [vmem:[#allocation2 + $0x70] sm:$0xff] }
 0x2f5   : > { %818 = vst.msk [vmem:[#allocation2 + $0xb0] sm:$0xff] %vm679_vm3, %v808_v11  ;;  %863 = vrot.lane.b32.xlu0 %v4096_v35, %s3905_s14  ;;  %v897_v35 = vld [vmem:[#allocation2 + $0x68] sm:$0xff]  ;;  %s3915_s14 = smov 8  }
 0x2f8   : > { %v835_v12 = vpop.permute.xlu1 %834  ;;  %v902_v42 = vld [vmem:[#allocation2 + $0x90] sm:$0xff] }
 0x2f9   : > { %845 = vst.msk [vmem:[#allocation2 + $0xd0] sm:$0xff] %vm679_vm3, %v835_v12 }
 0x2fc   : > { %v862_v14 = vpop.permute.xlu1 %861  ;;  %v906_v48 = vld [vmem:[#allocation2 + $0xb0] sm:$0xff] }
 0x2fd   : > { %872 = vst.msk [vmem:[#allocation2 + $0xf0] sm:$0xff] %vm679_vm3, %v862_v14 }
 0x300   : > { %v676_v15 = vpop.permute.xlu1 %675 }
 0x301   : > { %v4184_v17 = vadd.f32 %v676_v15, %v659_v55  ;;  %v910_v55 = vld [vmem:[#allocation2 + $0xd0] sm:$0xff] }
 0x303   : > { %686 = vrot.lane.b32.xlu1 %v4184_v17, %s3898_s6  ;;  %717 = vrot.lane.b32.xlu0 %v4184_v17, %s3907_s25  ;;  %s3911_s6 = smov 72   ;;  %s3920_s25 = smov 28  }
 0x304   : > { %v914_v59 = vld [vmem:[#allocation2 + $0xf0] sm:$0xff] }
 0x307   : > { %744 = vrot.lane.b32.xlu1 %v4184_v17, %s3908_s26  ;;  %771 = vrot.lane.b32.xlu0 %v4184_v17, %s3909_s27 }
 0x30b   : > { %798 = vrot.lane.b32.xlu1 %v4184_v17, %s3910_s28 }
 0x347   : > { %v713_v19 = vpop.permute.xlu0 %712 }
 0x348   : > { %716 = vst.msk [vmem:[#allocation3 + $0x8] sm:$0xff] %vm679_vm3, %v713_v19 }
 0x34b   : > { %v740_v20 = vpop.permute.xlu0 %739 }
 0x34c   : > { %743 = vst.msk [vmem:[#allocation3 + $0x10] sm:$0xff] %vm679_vm3, %v740_v20 }
 0x34f   : > { %v767_v21 = vpop.permute.xlu0 %766  ;;  %v917_v22 = vld [vmem:[#allocation3 + $0x8] sm:$0xff] }
 0x350   : > { %770 = vst.msk [vmem:[#allocation3 + $0x18] sm:$0xff] %vm679_vm3, %v767_v21  ;;  %3519 = vmatprep.subr.msk.mxu1 %vm679_vm3, %v917_v22 }
 0x351   : > { %3520 = vmatpush3.xpose.msk.msra.mxu1 %vm679_vm3, %v917_v22 }
 0x353   : > { %v794_v23 = vpop.permute.xlu0 %793  ;;  %v918_v25 = vld [vmem:[#allocation3 + $0x10] sm:$0xff] }
 0x354   : > { %797 = vst.msk [vmem:[#allocation3 + $0x20] sm:$0xff] %vm679_vm3, %v794_v23  ;;  %3522 = vmatmul.mubr.msk.f32.vlgmr.msra.gmra.mxu1 %vm679_vm3, %v889_v24  ;;  %3527 = vmatprep.subr.msk.mxu0 %vm679_vm3, %v918_v25 }
 0x355   : > { %3524 = vmatprep.mubr.msk.f32.mxu1 %vm679_vm3, %v890_v26  ;;  %3528 = vmatpush3.xpose.msk.msra.mxu0 %vm679_vm3, %v918_v25 }
 0x357   : > { %v821_v27 = vpop.permute.xlu0 %820  ;;  %v919_v1 = vld [vmem:[#allocation3 + $0x18] sm:$0xff] }
 0x358   : > { %824 = vst.msk [vmem:[#allocation3 + $0x28] sm:$0xff] %vm679_vm3, %v821_v27  ;;  %3525 = vmatmul.mubr.msk.f32.gmra.mxu1 %vm679_vm3, %v891_v28  ;;  %3530 = vmatmul.mubr.msk.f32.vlgmr.msra.gmra.mxu0 %vm679_vm3, %v893_v29 }
 0x359   : > { %3535 = vmatprep.subr.msk.mxu1 %vm679_vm3, %v919_v1  ;;  %3532 = vmatprep.mubr.msk.f32.mxu0 %vm679_vm3, %v894_v30 }
 0x35a   : > { %3536 = vmatpush3.xpose.msk.msra.mxu1 %vm679_vm3, %v919_v1  ;;  %3537 = vmatprep.mubr.msk.f32.mxu1 %vm679_vm3, %v896_v31 }
 0x35b   : > { %v848_v32 = vpop.permute.xlu0 %847  ;;  %v920_v34 = vld [vmem:[#allocation3 + $0x20] sm:$0xff] }
 0x35c   : > { %851 = vst.msk [vmem:[#allocation3 + $0x30] sm:$0xff] %vm679_vm3, %v848_v32  ;;  %3533 = vmatmul.mubr.msk.f32.gmra.mxu0 %vm679_vm3, %v895_v33  ;;  %3543 = vmatprep.subr.msk.mxu0 %vm679_vm3, %v920_v34 }
 0x35d   : > { %3538 = vmatmul.mubr.msk.f32.vlgmr.msra.gmra.mxu1 %vm679_vm3, %v897_v35  ;;  %3544 = vmatpush3.xpose.msk.msra.mxu0 %vm679_vm3, %v920_v34 }
 0x35e   : > { %3540 = vmatprep.mubr.msk.f32.mxu1 %vm679_vm3, %v898_v36  ;;  %3545 = vmatprep.mubr.msk.f32.mxu0 %vm679_vm3, %v900_v37 }
 0x35f   : > { %v875_v38 = vpop.permute.xlu0 %874  ;;  %v921_v40 = vld [vmem:[#allocation3 + $0x28] sm:$0xff] }
 0x360   : > { %878 = vst.msk [vmem:[#allocation3 + $0x38] sm:$0xff] %vm679_vm3, %v875_v38  ;;  %3546 = vmatmul.mubr.msk.f32.vlgmr.msra.gmra.mxu0 %vm679_vm3, %v901_v39  ;;  %3551 = vmatprep.subr.msk.mxu1 %vm679_vm3, %v921_v40 }
 0x361   : > { %3541 = vmatmul.mubr.msk.f32.gmra.mxu1 %vm679_vm3, %v899_v41  ;;  %3548 = vmatprep.mubr.msk.f32.mxu0 %vm679_vm3, %v902_v42 }
 0x362   : > { %3552 = vmatpush3.xpose.msk.msra.mxu1 %vm679_vm3, %v921_v40  ;;  %3553 = vmatprep.mubr.msk.f32.mxu1 %vm679_vm3, %v904_v43 }
 0x363   : > { %v837_v44 = vpop.permute.xlu0 %836  ;;  %v922_v46 = vld [vmem:[#allocation3 + $0x30] sm:$0xff] }
 0x364   : > { %846 = vst.msk [vmem:[#allocation2 + $0xd8] sm:$0xff] %vm679_vm3, %v837_v44  ;;  %3549 = vmatmul.mubr.msk.f32.gmra.mxu0 %vm679_vm3, %v903_v45  ;;  %3559 = vmatprep.subr.msk.mxu0 %vm679_vm3, %v922_v46 }
 0x365   : > { %3554 = vmatmul.mubr.msk.f32.vlgmr.msra.gmra.mxu1 %vm679_vm3, %v905_v47  ;;  %3560 = vmatpush3.xpose.msk.msra.mxu0 %vm679_vm3, %v922_v46 }
 0x366   : > { %3556 = vmatprep.mubr.msk.f32.mxu1 %vm679_vm3, %v906_v48  ;;  %3561 = vmatprep.mubr.msk.f32.mxu0 %vm679_vm3, %v908_v49 }
 0x367   : > { %v864_v50 = vpop.permute.xlu0 %863  ;;  %v923_v52 = vld [vmem:[#allocation3 + $0x38] sm:$0xff] }
 0x368   : > { %873 = vst.msk [vmem:[#allocation2 + $0xf8] sm:$0xff] %vm679_vm3, %v864_v50  ;;  %3562 = vmatmul.mubr.msk.f32.vlgmr.msra.gmra.mxu0 %vm679_vm3, %v909_v51  ;;  %3567 = vmatprep.subr.msk.mxu1 %vm679_vm3, %v923_v52 }
 0x369   : > { %3557 = vmatmul.mubr.msk.f32.gmra.mxu1 %vm679_vm3, %v907_v54  ;;  %3564 = vmatprep.mubr.msk.f32.mxu0 %vm679_vm3, %v910_v55 }
 0x36a   : > { %3568 = vmatpush3.xpose.msk.msra.mxu1 %vm679_vm3, %v923_v52  ;;  %3569 = vmatprep.mubr.msk.f32.mxu1 %vm679_vm3, %v912_v56 }
 0x36b   : > { %v911_v57 = vld [vmem:[#allocation2 + $0xd8] sm:$0xff] }
 0x36c   : > { %3565 = vmatmul.mubr.msk.f32.gmra.mxu0 %vm679_vm3, %v911_v57 }
 0x36d   : > { %3570 = vmatmul.mubr.msk.f32.vlgmr.msra.gmra.mxu1 %vm679_vm3, %v913_v58 }
 0x36e   : > { %3572 = vmatprep.mubr.msk.f32.mxu1 %vm679_vm3, %v914_v59 }
 0x36f   : > { %v915_v60 = vld [vmem:[#allocation2 + $0xf8] sm:$0xff] }
 0x371   : > { %3573 = vmatmul.mubr.msk.f32.gmra.mxu1 %vm679_vm3, %v915_v60 }
 0x375   : > { %v687_v61 = vpop.permute.xlu1 %686  ;;  %v718_v62 = vpop.permute.xlu0 %717 }
 0x376   : > { %689 = vst.msk [vmem:[#allocation4] sm:$0xff] %vm679_vm3, %v687_v61  ;;  %721 = vst.msk [vmem:[#allocation4 + $0x8] sm:$0xff] %vm679_vm3, %v718_v62 }
 0x379   : > { %v745_v63 = vpop.permute.xlu1 %744  ;;  %v772_v0 = vpop.permute.xlu0 %771 }
 0x37a   : > { %748 = vst.msk [vmem:[#allocation4 + $0x10] sm:$0xff] %vm679_vm3, %v745_v63  ;;  %775 = vst.msk [vmem:[#allocation4 + $0x18] sm:$0xff] %vm679_vm3, %v772_v0 }
 0x37d   : > { %v799_v2 = vpop.permute.xlu1 %798  ;;  %v924_v3 = vld [vmem:[#allocation4] sm:$0xff]  ;;  %v925_v4 = vld [vmem:[#allocation4 + $0x8] sm:$0xff] }
 0x37e   : > { %802 = vst.msk [vmem:[#allocation4 + $0x20] sm:$0xff] %vm679_vm3, %v799_v2  ;;  %3575 = vmatprep.subr.mxu0 %v924_v3  ;;  %3583 = vmatprep.subr.mxu1 %v925_v4 }
 0x37f   : > { %3576 = vmatpush3.msra.mxu0 %v924_v3  ;;  %3584 = vmatpush3.msra.mxu1 %v925_v4 }
 0x381   : > { %v4246_v5 = vld [vmem:[#allocation4 + $0x10] sm:$0xff]  ;;  %v4248_v6 = vld [vmem:[#allocation4 + $0x18] sm:$0xff] }
 0x382   : > { %3591 = vmatprep.subr.mxu0 %v4246_v5  ;;  %3599 = vmatprep.subr.mxu1 %v4248_v6 }
 0x3a1   : > { %v4252_v7 = vpop.f32.mrf.mxu0 }
 0x3a2   : > { %v1736_v8 = vsel %vm1732_vm4, %v4252_v7, -inf }
 0x3a3   : > { %1737 = vmax.xlane.f32.xlu0 %v1736_v8  ;;  %v4256_v9 = vpop.f32.mrf.mxu0 }
 0x3a4   : > { %v1733_v10 = vsel %vm1732_vm4, %v4256_v9, -inf }
 0x3a5   : > { %1734 = vmax.xlane.f32.xlu1 %v1733_v10  ;;  %v4260_v11 = vpop.f32.mrf.mxu0 }
 0x3a6   : > { %v1742_v12 = vsel %vm1732_vm4, %v4260_v11, -inf }
 0x3a7   : > { %1743 = vmax.xlane.f32.xlu0 %v1742_v12  ;;  %v4264_v14 = vpop.f32.mrf.mxu0 }
 0x3a8   : > { %v1739_v15 = vsel %vm1732_vm4, %v4264_v14, -inf }
 0x3a9   : > { %1740 = vmax.xlane.f32.xlu1 %v1739_v15 }
 0x414   : > { %v4268_v19 = vpop.f32.mrf.mxu1 }
 0x415   : > { %v1748_v20 = vsel %vm1732_vm4, %v4268_v19, -inf }
 0x416   : > { %1749 = vmax.xlane.f32.xlu0 %v1748_v20  ;;  %v4272_v21 = vpop.f32.mrf.mxu1 }
 0x417   : > { %v1745_v1 = vsel %vm1732_vm4, %v4272_v21, -inf }
 0x418   : > { %v4274_v22 = vpop.f32.mrf.mxu1  ;;  %v4276_v23 = vpop.f32.mrf.mxu0 }
 0x419   : > { %v1760_v24 = vsel %vm1732_vm4, %v4276_v23, -inf  ;;  %v1754_v33 = vsel %vm1732_vm4, %v4274_v22, -inf }
 0x41a   : > { %v4280_v25 = vpop.f32.mrf.mxu1  ;;  %1761 = vmax.xlane.f32.xlu0 %v1760_v24  ;;  %v4282_v26 = vpop.f32.mrf.mxu0 }
 0x41b   : > { %v1757_v27 = vsel %vm1732_vm4, %v4282_v26, -inf  ;;  %v1751_v31 = vsel %vm1732_vm4, %v4280_v25, -inf }
 0x41c   : > { %1758 = vmax.xlane.f32.xlu1 %v1757_v27  ;;  %v4286_v28 = vpop.f32.mrf.mxu0 }
 0x41d   : > { %v4288_v29 = vpop.f32.mrf.mxu1  ;;  %v1766_v37 = vsel %vm1732_vm4, %v4286_v28, -inf }
 0x41e   : > { %1746 = vmax.xlane.f32.xlu0 %v1745_v1  ;;  %v4292_v30 = vpop.f32.mrf.mxu0  ;;  %v1772_v41 = vsel %vm1732_vm4, %v4288_v29, -inf }
 0x41f   : > { %v4296_v32 = vpop.f32.mrf.mxu1  ;;  %v1763_v35 = vsel %vm1732_vm4, %v4292_v30, -inf }
 0x420   : > { %1752 = vmax.xlane.f32.xlu1 %v1751_v31  ;;  %v4300_v34 = vpop.f32.mrf.mxu0  ;;  %v1769_v39 = vsel %vm1732_vm4, %v4296_v32, -inf }
 0x421   : > { %v4304_v36 = vpop.f32.mrf.mxu1  ;;  %v1784_v45 = vsel %vm1732_vm4, %v4300_v34, -inf }
 0x422   : > { %1755 = vmax.xlane.f32.xlu0 %v1754_v33  ;;  %v4308_v38 = vpop.f32.mrf.mxu0  ;;  %v1778_v50 = vsel %vm1732_vm4, %v4304_v36, -inf }
 0x423   : > { %v4312_v40 = vpop.f32.mrf.mxu1  ;;  %v1781_v43 = vsel %vm1732_vm4, %v4308_v38, -inf }
 0x424   : > { %1764 = vmax.xlane.f32.xlu1 %v1763_v35  ;;  %v4316_v42 = vpop.f32.mrf.mxu0  ;;  %v1775_v48 = vsel %vm1732_vm4, %v4312_v40, -inf }
 0x425   : > { %v4320_v44 = vpop.f32.mrf.mxu1  ;;  %v1790_v56 = vsel %vm1732_vm4, %v4316_v42, -inf }
 0x426   : > { %1767 = vmax.xlane.f32.xlu0 %v1766_v37  ;;  %v4324_v47 = vpop.f32.mrf.mxu0  ;;  %v1796_v63 = vsel %vm1732_vm4, %v4320_v44, -inf }
 0x427   : > { %v4328_v49 = vpop.f32.mrf.mxu1  ;;  %v1787_v52 = vsel %vm1732_vm4, %v4324_v47, -inf }
 0x428   : > { %1770 = vmax.xlane.f32.xlu1 %v1769_v39  ;;  %v4332_v51 = vpop.f32.mrf.mxu0  ;;  %v1793_v59 = vsel %vm1732_vm4, %v4328_v49, -inf }
 0x429   : > { %v4336_v54 = vpop.f32.mrf.mxu1  ;;  %v1808_v12 = vsel %vm1732_vm4, %v4332_v51, -inf }
 0x42a   : > { %1773 = vmax.xlane.f32.xlu0 %v1772_v41  ;;  %v4345_v61 = vpop.f32.mrf.mxu0 }
 0x42b   : > { %v4343_v60 = vpop.f32.mrf.mxu1  ;;  %v1805_v2 = vsel %vm1732_vm4, %v4345_v61, -inf }
 0x42c   : > { %1782 = vmax.xlane.f32.xlu1 %v1781_v43  ;;  %v1738_v57 = vpop.xlane.xlu0 %1737  ;;  %v4352_v3 = vpop.f32.mrf.mxu0 }
 0x42d   : > { %v1830_v62 = vsub.f32 %v4252_v7, %v1738_v57  ;;  %v4354_v4 = vpop.f32.mrf.mxu1  ;;  %v1814_v35 = vsel %vm1732_vm4, %v4352_v3, -inf }
 0x42e   : > { %v1735_v46 = vpop.xlane.xlu1 %1734  ;;  %1785 = vmax.xlane.f32.xlu0 %v1784_v45  ;;  %v4361_v15 = vpop.f32.mrf.mxu0  ;;  %v1820_v39 = vsel %vm1732_vm4, %v4354_v4, -inf }
 0x42f   : > { %v1863_v8 = vmul.f32 1.442695, %v1830_v62  ;;  %v1829_v10 = vsub.f32 %v4256_v9, %v1735_v46  ;;  %v4363_v20 = vpop.f32.mrf.mxu1  ;;  %v1802_v9 = vsel %vm1732_vm4, %v4336_v54, -inf  ;;  %v1811_v1 = vsel %vm1732_vm4, %v4361_v15, -inf }
 0x430   : > { %1776 = vmax.xlane.f32.xlu1 %v1775_v48  ;;  %v1744_v7 = vpop.xlane.xlu0 %1743  ;;  %v1817_v37 = vsel %vm1732_vm4, %v4363_v20, -inf }
 0x431   : > { %v1861_v24 = vmul.f32 1.442695, %v1829_v10  ;;  %v1832_v27 = vsub.f32 %v4260_v11, %v1744_v7  ;;  %v4370_v31 = vpop.f32.mrf.mxu1 }
 0x432   : > { %1779 = vmax.xlane.f32.xlu0 %v1778_v50  ;;  %v1741_v55 = vpop.xlane.xlu1 %1740  ;;  %v1826_v45 = vsel %vm1732_vm4, %v4370_v31, -inf }
 0x433   : > { %v1831_v58 = vsub.f32 %v4264_v14, %v1741_v55  ;;  %v1799_v14 = vsel %vm1732_vm4, %v4343_v60, -inf  ;;  %v1867_v33 = vmul.f32 1.442695, %v1832_v27  ;;  %v4376_v11 = vpop.f32.mrf.mxu1 }
 0x434   : > { %1788 = vmax.xlane.f32.xlu1 %v1787_v52  ;;  %v1823_v41 = vsel %vm1732_vm4, %v4376_v11, -inf }
 0x435   : > { %v1865_v0 = vmul.f32 1.442695, %v1831_v58 }
 0x436   : > { %1791 = vmax.xlane.f32.xlu0 %v1790_v56 }
 0x437   : > { %3728 = vpow2.f32 %v1865_v0 }
 0x438   : > { %1794 = vmax.xlane.f32.xlu1 %v1793_v59  ;;  %3730 = vpow2.f32 %v1863_v8 }
 0x439   : > { %3732 = vpow2.f32 %v1861_v24 }
 0x43a   : > { %1797 = vmax.xlane.f32.xlu0 %v1796_v63  ;;  %3734 = vpow2.f32 %v1867_v33 }
 0x43c   : > { %1806 = vmax.xlane.f32.xlu1 %v1805_v2 }
 0x43e   : > { %1809 = vmax.xlane.f32.xlu0 %v1808_v12 }
 0x440   : > { %1800 = vmax.xlane.f32.xlu1 %v1799_v14 }
 0x442   : > { %1803 = vmax.xlane.f32.xlu0 %v1802_v9 }
 0x444   : > { %1812 = vmax.xlane.f32.xlu1 %v1811_v1  ;;  %v4382_v43 = vpop.eup %3728 }
 0x445   : > { %v4386_v46 = vpop.eup %3730  ;;  %v1931_v48 = vsel %vm1732_vm4, %v4382_v43, 0.0 }
 0x446   : > { %1815 = vmax.xlane.f32.xlu0 %v1814_v35  ;;  %v1928_v50 = vsel %vm1732_vm4, %v4386_v46, 0.0  ;;  %v4392_v52 = vpop.eup %3732 }
 0x447   : > { %v1925_v55 = vsel %vm1732_vm4, %v4392_v52, 0.0  ;;  %v4396_v56 = vpop.eup %3734 }
 0x448   : > { %1818 = vmax.xlane.f32.xlu1 %v1817_v37  ;;  %v1934_v57 = vsel %vm1732_vm4, %v4396_v56, 0.0 }
 0x44a   : > { %1821 = vmax.xlane.f32.xlu0 %v1820_v39 }
 0x44c   : > { %1824 = vmax.xlane.f32.xlu1 %v1823_v41 }
 0x44e   : > { %1827 = vmax.xlane.f32.xlu0 %v1826_v45 }
 0x450   : > { %1932 = vadd.xlane.f32.xlu1 %v1931_v48 }
 0x452   : > { %1929 = vadd.xlane.f32.xlu0 %v1928_v50 }
 0x456   : > { %1926 = vadd.xlane.f32.xlu0 %v1925_v55 }
 0x45a   : > { %1935 = vadd.xlane.f32.xlu0 %v1934_v57 }
 0x49f   : > { %v1750_v58 = vpop.xlane.xlu0 %1749 }
 0x4a0   : > { %v1834_v59 = vsub.f32 %v4268_v19, %v1750_v58 }
 0x4a2   : > { %v1871_v62 = vmul.f32 1.442695, %v1834_v59 }
 0x4a3   : > { %v1762_v63 = vpop.xlane.xlu0 %1761 }
 0x4a4   : > { %3736 = vpow2.f32 %v1871_v62  ;;  %v1838_v0 = vsub.f32 %v4276_v23, %v1762_v63 }
 0x4a5   : > { %v1759_v2 = vpop.xlane.xlu1 %1758 }
 0x4a6   : > { %v1879_v8 = vmul.f32 1.442695, %v1838_v0  ;;  %v1837_v10 = vsub.f32 %v4282_v26, %v1759_v2 }
 0x4a7   : > { %v1747_v12 = vpop.xlane.xlu0 %1746 }
 0x4a8   : > { %3738 = vpow2.f32 %v1879_v8  ;;  %v1833_v7 = vsub.f32 %v4272_v21, %v1747_v12  ;;  %v1877_v24 = vmul.f32 1.442695, %v1837_v10 }
 0x4a9   : > { %v1753_v14 = vpop.xlane.xlu1 %1752 }
 0x4aa   : > { %v1869_v27 = vmul.f32 1.442695, %v1833_v7  ;;  %v1835_v26 = vsub.f32 %v4280_v25, %v1753_v14 }
 0x4ab   : > { %v1756_v9 = vpop.xlane.xlu0 %1755 }
 0x4ac   : > { %3740 = vpow2.f32 %v1869_v27  ;;  %v1836_v19 = vsub.f32 %v4274_v22, %v1756_v9  ;;  %v1873_v22 = vmul.f32 1.442695, %v1835_v26 }
 0x4ad   : > { %v1765_v1 = vpop.xlane.xlu1 %1764  ;;  %3742 = vpow2.f32 %v1877_v24 }
 0x4ae   : > { %v1875_v33 = vmul.f32 1.442695, %v1836_v19  ;;  %v1839_v50 = vsub.f32 %v4292_v30, %v1765_v1 }
 0x4af   : > { %v1768_v35 = vpop.xlane.xlu0 %1767 }
 0x4b0   : > { %v1840_v23 = vsub.f32 %v4286_v28, %v1768_v35  ;;  %3744 = vpow2.f32 %v1875_v33  ;;  %v1881_v62 = vmul.f32 1.442695, %v1839_v50 }
 0x4b1   : > { %v4406_v37 = vpop.eup %3736  ;;  %v1771_v39 = vpop.xlane.xlu1 %1770 }
 0x4b2   : > { %v1883_v21 = vmul.f32 1.442695, %v1840_v23  ;;  %v1940_v41 = vsel %vm1732_vm4, %v4406_v37, 0.0  ;;  %v1841_v19 = vsub.f32 %v4296_v32, %v1771_v39 }
 0x4b3   : > { %1941 = vadd.xlane.f32.xlu0 %v1940_v41  ;;  %v1774_v45 = vpop.xlane.xlu0 %1773 }
 0x4b4   : > { %3746 = vpow2.f32 %v1883_v21  ;;  %v1842_v63 = vsub.f32 %v4288_v29, %v1774_v45  ;;  %v1885_v21 = vmul.f32 1.442695, %v1841_v19 }
 0x4b5   : > { %v4411_v48 = vpop.eup %3738  ;;  %v1783_v55 = vpop.xlane.xlu1 %1782  ;;  %3748 = vpow2.f32 %v1873_v22 }
 0x4b6   : > { %v1845_v28 = vsub.f32 %v4308_v38, %v1783_v55  ;;  %v1952_v25 = vsel %vm1732_vm4, %v4411_v48, 0.0  ;;  %v1887_v12 = vmul.f32 1.442695, %v1842_v63 }
 0x4b7   : > { %1953 = vadd.xlane.f32.xlu0 %v1952_v25  ;;  %v1786_v57 = vpop.xlane.xlu0 %1785 }
 0x4b8   : > { %v1893_v58 = vmul.f32 1.442695, %v1845_v28  ;;  %v1846_v7 = vsub.f32 %v4300_v34, %v1786_v57 }
 0x4b9   : > { %v4417_v59 = vpop.eup %3740  ;;  %v1777_v0 = vpop.xlane.xlu1 %1776 }
 0x4ba   : > { %3750 = vpow2.f32 %v1893_v58  ;;  %v1843_v30 = vsub.f32 %v4312_v40, %v1777_v0  ;;  %v1937_v2 = vsel %vm1732_vm4, %v4417_v59, 0.0  ;;  %v4423_v38 = vpop.eup %3742  ;;  %v1895_v1 = vmul.f32 1.442695, %v1846_v7 }
 0x4bb   : > { %1938 = vadd.xlane.f32.xlu0 %v1937_v2  ;;  %v1780_v8 = vpop.xlane.xlu0 %1779  ;;  %3752 = vpow2.f32 %v1881_v62  ;;  %v1949_v24 = vsel %vm1732_vm4, %v4423_v38, 0.0 }
 0x4bc   : > { %v1889_v10 = vmul.f32 1.442695, %v1843_v30  ;;  %v1844_v41 = vsub.f32 %v4304_v36, %v1780_v8 }
 0x4bd   : > { %v1789_v14 = vpop.xlane.xlu1 %1788  ;;  %v4429_v40 = vpop.eup %3744 }
 0x4be   : > { %3754 = vpow2.f32 %v1889_v10  ;;  %v1847_v29 = vsub.f32 %v4324_v47, %v1789_v14  ;;  %v1946_v35 = vsel %vm1732_vm4, %v4429_v40, 0.0  ;;  %v1891_v25 = vmul.f32 1.442695, %v1844_v41 }
 0x4bf   : > { %1950 = vadd.xlane.f32.xlu0 %v1949_v24  ;;  %v1792_v27 = vpop.xlane.xlu0 %1791  ;;  %3756 = vpow2.f32 %v1887_v12 }
 0x4c0   : > { %v1897_v9 = vmul.f32 1.442695, %v1847_v29  ;;  %v1848_v36 = vsub.f32 %v4316_v42, %v1792_v27 }
 0x4c1   : > { %v1795_v33 = vpop.xlane.xlu1 %1794  ;;  %v4435_v47 = vpop.eup %3746 }
 0x4c2   : > { %3758 = vpow2.f32 %v1897_v9  ;;  %v1849_v34 = vsub.f32 %v4328_v49, %v1795_v33  ;;  %v4438_v32 = vpop.eup %3748  ;;  %v1958_v49 = vsel %vm1732_vm4, %v4435_v47, 0.0  ;;  %v1899_v42 = vmul.f32 1.442695, %v1848_v36 }
 0x4c3   : > { %1947 = vadd.xlane.f32.xlu0 %v1946_v35  ;;  %v1798_v23 = vpop.xlane.xlu0 %1797  ;;  %3760 = vpow2.f32 %v1895_v1  ;;  %v1943_v62 = vsel %vm1732_vm4, %v4438_v32, 0.0 }
 0x4c4   : > { %v1901_v26 = vmul.f32 1.442695, %v1849_v34  ;;  %v1850_v8 = vsub.f32 %v4320_v44, %v1798_v23 }
 0x4c5   : > { %v1807_v45 = vpop.xlane.xlu1 %1806 }
 0x4c6   : > { %3762 = vpow2.f32 %v1901_v26  ;;  %v1853_v39 = vsub.f32 %v4345_v61, %v1807_v45  ;;  %v1903_v44 = vmul.f32 1.442695, %v1850_v8 }
 0x4c7   : > { %v4443_v22 = vpop.eup %3750  ;;  %1959 = vadd.xlane.f32.xlu0 %v1958_v49  ;;  %v1810_v50 = vpop.xlane.xlu0 %1809  ;;  %3764 = vpow2.f32 %v1885_v21 }
 0x4c8   : > { %v1909_v55 = vmul.f32 1.442695, %v1853_v39  ;;  %v1973_v28 = vsel %vm1732_vm4, %v4443_v22, 0.0  ;;  %v4448_v58 = vpop.eup %3752  ;;  %v1854_v1 = vsub.f32 %v4332_v51, %v1810_v50 }
 0x4c9   : > { %v1801_v57 = vpop.xlane.xlu1 %1800  ;;  %1974 = vadd.xlane.f32.xlu1 %v1973_v28  ;;  %v1955_v7 = vsel %vm1732_vm4, %v4448_v58, 0.0 }
 0x4ca   : > { %3766 = vpow2.f32 %v1909_v55  ;;  %v1851_v61 = vsub.f32 %v4343_v60, %v1801_v57 }
 0x4cb   : > { %v4453_v63 = vpop.eup %3754  ;;  %1944 = vadd.xlane.f32.xlu0 %v1943_v62  ;;  %v1804_v0 = vpop.xlane.xlu0 %1803  ;;  %3768 = vpow2.f32 %v1891_v25 }
 0x4cc   : > { %v1905_v30 = vmul.f32 1.442695, %v1851_v61  ;;  %v1967_v2 = vsel %vm1732_vm4, %v4453_v63, 0.0  ;;  %v4458_v12 = vpop.eup %3756  ;;  %v1852_v21 = vsub.f32 %v4336_v54, %v1804_v0 }
 0x4cd   : > { %v1813_v10 = vpop.xlane.xlu1 %1812  ;;  %1968 = vadd.xlane.f32.xlu1 %v1967_v2  ;;  %v1964_v33 = vsel %vm1732_vm4, %v4458_v12, 0.0 }
 0x4ce   : > { %3770 = vpow2.f32 %v1905_v30  ;;  %v1855_v60 = vsub.f32 %v4361_v15, %v1813_v10  ;;  %v1907_v55 = vmul.f32 1.442695, %v1852_v21 }
 0x4cf   : > { %v4463_v14 = vpop.eup %3758  ;;  %1956 = vadd.xlane.f32.xlu0 %v1955_v7  ;;  %v1816_v29 = vpop.xlane.xlu0 %1815  ;;  %3772 = vpow2.f32 %v1899_v42 }
 0x4d0   : > { %v1913_v24 = vmul.f32 1.442695, %v1855_v60  ;;  %v1979_v27 = vsel %vm1732_vm4, %v4463_v14, 0.0  ;;  %v4467_v19 = vpop.eup %3760  ;;  %v1856_v28 = vsub.f32 %v4352_v3, %v1816_v29 }
 0x4d1   : > { %v1819_v9 = vpop.xlane.xlu1 %1818  ;;  %1980 = vadd.xlane.f32.xlu1 %v1979_v27  ;;  %v1976_v45 = vsel %vm1732_vm4, %v4467_v19, 0.0 }
 0x4d2   : > { %3774 = vpow2.f32 %v1913_v24  ;;  %v1857_v15 = vsub.f32 %v4363_v20, %v1819_v9  ;;  %v1911_v20 = vmul.f32 1.442695, %v1854_v1  ;;  %v1915_v30 = vmul.f32 1.442695, %v1856_v28  ;;  %v928_v28 = vld [vmem:[#allocation4 + $0x20] sm:$0xff] }
 0x4d3   : > { %v4473_v34 = vpop.eup %3762  ;;  %1965 = vadd.xlane.f32.xlu0 %v1964_v33  ;;  %v1822_v35 = vpop.xlane.xlu0 %1821  ;;  %3776 = vpow2.f32 %v1903_v44 }
 0x4d4   : > { %v1917_v23 = vmul.f32 1.442695, %v1857_v15  ;;  %v1985_v26 = vsel %vm1732_vm4, %v4473_v34, 0.0  ;;  %v4480_v51 = vpop.eup %3764  ;;  %v1858_v2 = vsub.f32 %v4354_v4, %v1822_v35 }
 0x4d5   : > { %1986 = vadd.xlane.f32.xlu1 %v1985_v26  ;;  %v4478_v41 = vpop.xlane.xlu1 %1824  ;;  %v1961_v25 = vsel %vm1732_vm4, %v4480_v51, 0.0 }
 0x4d6   : > { %3778 = vpow2.f32 %v1917_v23  ;;  %v1919_v7 = vmul.f32 1.442695, %v1858_v2  ;;  %v3019_v2 = vld [vmem:[%s4676_s3 + $0x18] sm:$0xff] }
 0x4d7   : > { %v4484_v39 = vpop.eup %3766  ;;  %1977 = vadd.xlane.f32.xlu0 %v1976_v45  ;;  %v1828_v49 = vpop.xlane.xlu0 %1827  ;;  %3780 = vpow2.f32 %v1911_v20 }
 0x4d8   : > { %v1997_v50 = vsel %vm1732_vm4, %v4484_v39, 0.0  ;;  %v4488_v54 = vpop.eup %3768  ;;  %3782 = vpow2.f32 %v1907_v55  ;;  %v1860_v4 = vsub.f32 %v4370_v31, %v1828_v49 }
 0x4d9   : > { %1998 = vadd.xlane.f32.xlu1 %v1997_v50  ;;  %v1933_v57 = vpop.xlane.xlu1 %1932  ;;  %v1970_v3 = vsel %vm1732_vm4, %v4488_v54, 0.0 }
 0x4da   : > { %3784 = vrcp.f32 %v1933_v57  ;;  %v1923_v9 = vmul.f32 1.442695, %v1860_v4 }
 0x4db   : > { %v4493_v36 = vpop.eup %3770  ;;  %1962 = vadd.xlane.f32.xlu0 %v1961_v25  ;;  %v1930_v61 = vpop.xlane.xlu0 %1929 }
 0x4dc   : > { %v1991_v62 = vsel %vm1732_vm4, %v4493_v36, 0.0  ;;  %v4497_v0 = vpop.eup %3772  ;;  %3786 = vrcp.f32 %v1930_v61 }
 0x4dd   : > { %1992 = vadd.xlane.f32.xlu1 %v1991_v62  ;;  %v1982_v29 = vsel %vm1732_vm4, %v4497_v0, 0.0 }
 0x4df   : > { %v4502_v42 = vpop.eup %3774  ;;  %1971 = vadd.xlane.f32.xlu0 %v1970_v3  ;;  %v1927_v8 = vpop.xlane.xlu0 %1926 }
 0x4e0   : > { %3788 = vrcp.f32 %v1927_v8  ;;  %v2003_v10 = vsel %vm1732_vm4, %v4502_v42, 0.0  ;;  %v4506_v60 = vpop.eup %3776 }
 0x4e1   : > { %2004 = vadd.xlane.f32.xlu1 %v2003_v10  ;;  %3790 = vpow2.f32 %v1915_v30  ;;  %v1988_v1 = vsel %vm1732_vm4, %v4506_v60, 0.0 }
 0x4e3   : > { %v4511_v24 = vpop.eup %3778  ;;  %1983 = vadd.xlane.f32.xlu0 %v1982_v29  ;;  %v1936_v27 = vpop.xlane.xlu0 %1935 }
 0x4e4   : > { %3792 = vrcp.f32 %v1936_v27  ;;  %v2009_v44 = vsel %vm1732_vm4, %v4511_v24, 0.0  ;;  %v4517_v15 = vpop.eup %3780 }
 0x4e5   : > { %2010 = vadd.xlane.f32.xlu1 %v2009_v44  ;;  %3794 = vpow2.f32 %v1919_v7  ;;  %v4519_v31 = vpop.eup %3782  ;;  %v2000_v33 = vsel %vm1732_vm4, %v4517_v15, 0.0 }
 0x4e6   : > { %3796 = vpow2.f32 %v1923_v9  ;;  %v1994_v21 = vsel %vm1732_vm4, %v4519_v31, 0.0 }
 0x4e7   : > { %1989 = vadd.xlane.f32.xlu0 %v1988_v1  ;;  %v3785_v35 = vpop.eup %3784 }
 0x4e8   : > { %v2055_v50 = vmul.f32 %v3785_v35, %v4382_v43 }
 0x4e9   : > { %v3787_v23 = vpop.eup %3786 }
 0x4ea   : > { %v2054_v49 = vmul.f32 %v3787_v23, %v4386_v46 }
 0x4eb   : > { %2001 = vadd.xlane.f32.xlu0 %v2000_v33 }
 0x4ed   : > { %v3789_v26 = vpop.eup %3788 }
 0x4ee   : > { %v2053_v20 = vmul.f32 %v3789_v26, %v4392_v52  ;;  %v4526_v45 = vpop.eup %3790 }
 0x4ef   : > { %1995 = vadd.xlane.f32.xlu0 %v1994_v21  ;;  %v2006_v52 = vsel %vm1732_vm4, %v4526_v45, 0.0 }
 0x4f0   : > { %3577 = vmatprep.mubr.msk.f32.mxu0 %vm1732_vm4, %v2053_v20 }
 0x4f1   : > { %v3793_v55 = vpop.eup %3792  ;;  %3578 = vmatmul.mubr.msk.f32.vlgmr.msra.gmra.mxu0 %vm1732_vm4, %v2054_v49 }
 0x4f2   : > { %3592 = vmatpush3.msra.mxu0 %v4246_v5  ;;  %3580 = vmatprep.mubr.msk.f32.mxu0 %vm1732_vm4, %v2055_v50  ;;  %v2056_v25 = vmul.f32 %v3793_v55, %v4396_v56  ;;  %v4537_v57 = vpop.eup %3794  ;;  %v1859_v56 = vsub.f32 %v4376_v11, %v4478_v41  ;;  %v3018_v11 = vld [vmem:[%s4676_s3 + $0x10] sm:$0xff] }
 0x4f3   : > { %3607 = vmatprep.subr.mxu0 %v928_v28  ;;  %2007 = vadd.xlane.f32.xlu0 %v2006_v52  ;;  %v2012_v5 = vsel %vm1732_vm4, %v4537_v57, 0.0  ;;  %v4543_v43 = vpop.eup %3796 }
 0x4f4   : > { %v2018_v46 = vsel %vm1732_vm4, %v4543_v43, 0.0  ;;  %v1921_v61 = vmul.f32 1.442695, %v1859_v56 }
 0x4f5   : > { %3581 = vmatmul.mubr.msk.f32.gmra.mxu0 %vm1732_vm4, %v2056_v25 }
 0x4f6   : > { %852 = vrot.lane.b32.xlu1 %v4184_v17, %s3911_s6  ;;  %3798 = vpow2.f32 %v1921_v61 }
 0x4f7   : > { %2013 = vadd.xlane.f32.xlu0 %v2012_v5 }
 0x4fb   : > { %2019 = vadd.xlane.f32.xlu0 %v2018_v46 }
 0x503   : > { %v4550_v62 = vpop.eup %3798 }
 0x504   : > { %v2015_v30 = vsel %vm1732_vm4, %v4550_v62, 0.0 }
 0x511   : > { %825 = vrot.lane.b32.xlu0 %v4184_v17, %s3912_s29 }
 0x515   : > { %3033 = vrot.lane.b32.xlu0 %v3018_v11, %s3906_s17 }
 0x51a   : > { %2016 = vadd.xlane.f32.xlu1 %v2015_v30 }
 0x52b   : > { %879 = vrot.lane.b32.xlu1 %v4184_v17, %s3913_s30 }
 0x52f   : > { %3035 = vrot.lane.b32.xlu1 %v3019_v2, %s3906_s17 }
 0x53c   : > { %v1942_v41 = vpop.xlane.xlu0 %1941 }
 0x53d   : > { %3800 = vrcp.f32 %v1942_v41 }
 0x540   : > { %v1954_v3 = vpop.xlane.xlu0 %1953 }
 0x544   : > { %v1939_v8 = vpop.xlane.xlu0 %1938 }
 0x545   : > { %3802 = vrcp.f32 %v1939_v8 }
 0x546   : > { %3804 = vrcp.f32 %v1954_v3 }
 0x548   : > { %v1951_v10 = vpop.xlane.xlu0 %1950 }
 0x549   : > { %3806 = vrcp.f32 %v1951_v10 }
 0x54a   : > { %v3801_v4 = vpop.eup %3800 }
 0x54b   : > { %v2058_v9 = vmul.f32 %v3801_v4, %v4406_v37 }
 0x54c   : > { %v1948_v17 = vpop.xlane.xlu0 %1947 }
 0x54d   : > { %3808 = vrcp.f32 %v1948_v17 }
 0x550   : > { %v1960_v7 = vpop.xlane.xlu0 %1959 }
 0x552   : > { %v3803_v29 = vpop.eup %3802  ;;  %v1975_v27 = vpop.xlane.xlu1 %1974 }
 0x553   : > { %v2057_v44 = vmul.f32 %v3803_v29, %v4417_v59  ;;  %v3805_v33 = vpop.eup %3804 }
 0x554   : > { %v1945_v1 = vpop.xlane.xlu0 %1944  ;;  %v2062_v21 = vmul.f32 %v3805_v33, %v4411_v48 }
 0x555   : > { %3810 = vrcp.f32 %v1945_v1  ;;  %3585 = vmatprep.mubr.msk.f32.mxu1 %vm1732_vm4, %v2057_v44 }
 0x556   : > { %v3807_v35 = vpop.eup %3806  ;;  %v1969_v23 = vpop.xlane.xlu1 %1968  ;;  %3586 = vmatmul.mubr.msk.f32.vlgmr.msra.gmra.mxu1 %vm1732_vm4, %v2058_v9  ;;  %3812 = vrcp.f32 %v1960_v7 }
 0x557   : > { %3600 = vmatpush3.msra.mxu1 %v4248_v6  ;;  %v2061_v26 = vmul.f32 %v3807_v35, %v4423_v38  ;;  %3814 = vrcp.f32 %v1975_v27 }
 0x558   : > { %v1957_v59 = vpop.xlane.xlu0 %1956 }
 0x559   : > { %3816 = vrcp.f32 %v1957_v59  ;;  %3593 = vmatprep.mubr.msk.f32.mxu0 %vm1732_vm4, %v2061_v26 }
 0x55a   : > { %v1981_v37 = vpop.xlane.xlu1 %1980  ;;  %3594 = vmatmul.mubr.msk.f32.vlgmr.msra.gmra.mxu0 %vm1732_vm4, %v2062_v21  ;;  %v3809_v55 = vpop.eup %3808 }
 0x55b   : > { %3608 = vmatpush3.msra.mxu0 %v928_v28  ;;  %3818 = vrcp.f32 %v1981_v37  ;;  %v2060_v5 = vmul.f32 %v3809_v55, %v4429_v40 }
 0x55c   : > { %v1966_v20 = vpop.xlane.xlu0 %1965 }
 0x55e   : > { %v1987_v49 = vpop.xlane.xlu1 %1986 }
 0x560   : > { %v1978_v50 = vpop.xlane.xlu0 %1977 }
 0x561   : > { %3820 = vrcp.f32 %v1978_v50 }
 0x562   : > { %v3811_v6 = vpop.eup %3810  ;;  %v1999_v52 = vpop.xlane.xlu1 %1998  ;;  %3822 = vrcp.f32 %v1969_v23 }
 0x563   : > { %v2059_v48 = vmul.f32 %v3811_v6, %v4438_v32  ;;  %v3813_v38 = vpop.eup %3812  ;;  %3824 = vrcp.f32 %v1966_v20 }
 0x564   : > { %v1963_v25 = vpop.xlane.xlu0 %1962  ;;  %v3815_v46 = vpop.eup %3814  ;;  %v2064_v2 = vmul.f32 %v3813_v38, %v4435_v47 }
 0x565   : > { %3826 = vrcp.f32 %v1963_v25  ;;  %3588 = vmatprep.mubr.msk.f32.mxu1 %vm1732_vm4, %v2059_v48  ;;  %v2069_v32 = vmul.f32 %v3815_v46, %v4443_v22 }
 0x566   : > { %v3817_v28 = vpop.eup %3816  ;;  %v1993_v56 = vpop.xlane.xlu1 %1992  ;;  %3589 = vmatmul.mubr.msk.f32.gmra.mxu1 %vm1732_vm4, %v2060_v5  ;;  %3828 = vrcp.f32 %v1987_v49 }
 0x567   : > { %v2063_v61 = vmul.f32 %v3817_v28, %v4448_v58 }
 0x568   : > { %v1972_v30 = vpop.xlane.xlu0 %1971  ;;  %v3819_v41 = vpop.eup %3818 }
 0x569   : > { %3830 = vrcp.f32 %v1972_v30  ;;  %3596 = vmatprep.mubr.msk.f32.mxu0 %vm1732_vm4, %v2063_v61  ;;  %v2071_v17 = vmul.f32 %v3819_v41, %v4463_v14 }
 0x56a   : > { %v2005_v40 = vpop.xlane.xlu1 %2004  ;;  %3597 = vmatmul.mubr.msk.f32.gmra.mxu0 %vm1732_vm4, %v2064_v2  ;;  %3832 = vrcp.f32 %v1999_v52 }
 0x56b   : > { %3609 = vmatprep.mubr.msk.f32.mxu0 %vm1732_vm4, %v2069_v32 }
 0x56c   : > { %v1984_v11 = vpop.xlane.xlu0 %1983 }
 0x56d   : > { %3834 = vrcp.f32 %v1984_v11 }
 0x56e   : > { %v3821_v3 = vpop.eup %3820  ;;  %v2011_v58 = vpop.xlane.xlu1 %2010  ;;  %3836 = vrcp.f32 %v2005_v40 }
 0x56f   : > { %v2070_v8 = vmul.f32 %v3821_v3, %v4467_v19  ;;  %v3823_v10 = vpop.eup %3822 }
 0x570   : > { %v1990_v47 = vpop.xlane.xlu0 %1989  ;;  %v3825_v7 = vpop.eup %3824  ;;  %v2067_v14 = vmul.f32 %v3823_v10, %v4453_v63 }
 0x571   : > { %3610 = vmatmul.mubr.msk.f32.vlgmr.msra.gmra.mxu0 %vm1732_vm4, %v2070_v8  ;;  %v2066_v27 = vmul.f32 %v3825_v7, %v4458_v12 }
 0x572   : > { %v3827_v22 = vpop.eup %3826  ;;  %v853_v4 = vpop.permute.xlu1 %852  ;;  %3612 = vmatprep.mubr.msk.f32.mxu0 %vm1732_vm4, %v2071_v17 }
 0x573   : > { %856 = vst.msk [vmem:[#allocation4 + $0x30] sm:$0xff] %vm679_vm3, %v853_v4  ;;  %v2065_v29 = vmul.f32 %v3827_v22, %v4480_v51  ;;  %v3829_v19 = vpop.eup %3828 }
 0x574   : > { %v2002_v44 = vpop.xlane.xlu0 %2001  ;;  %v2073_v51 = vmul.f32 %v3829_v19, %v4473_v34 }
 0x575   : > { %3838 = vrcp.f32 %v2002_v44  ;;  %3601 = vmatprep.mubr.msk.f32.mxu1 %vm1732_vm4, %v2065_v29 }
 0x576   : > { %v3831_v9 = vpop.eup %3830  ;;  %3602 = vmatmul.mubr.msk.f32.vlgmr.msra.gmra.mxu1 %vm1732_vm4, %v2066_v27 }
 0x577   : > { %3604 = vmatprep.mubr.msk.f32.mxu1 %vm1732_vm4, %v2067_v14  ;;  %v2068_v1 = vmul.f32 %v3831_v9, %v4488_v54  ;;  %v3833_v35 = vpop.eup %3832 }
 0x578   : > { %v1996_v33 = vpop.xlane.xlu0 %1995  ;;  %v2077_v21 = vmul.f32 %v3833_v35, %v4484_v39 }
 0x57a   : > { %v3835_v12 = vpop.eup %3834  ;;  %3605 = vmatmul.mubr.msk.f32.gmra.mxu1 %vm1732_vm4, %v2068_v1  ;;  %v930_v23 = vld [vmem:[#allocation4 + $0x30] sm:$0xff] }
 0x57b   : > { %3617 = vmatprep.mubr.msk.f32.mxu1 %vm1732_vm4, %v2073_v51  ;;  %3623 = vmatprep.subr.mxu0 %v930_v23  ;;  %v2072_v63 = vmul.f32 %v3835_v12, %v4497_v0  ;;  %v3837_v34 = vpop.eup %3836 }
 0x57c   : > { %3624 = vmatpush3.msra.mxu0 %v930_v23  ;;  %v2008_v26 = vpop.xlane.xlu0 %2007  ;;  %v2079_v49 = vmul.f32 %v3837_v34, %v4502_v42  ;;  %v3017_v34 = vld [vmem:[%s4676_s3 + $0x8] sm:$0xff] }
 0x57d   : > { %3840 = vrcp.f32 %v2008_v26  ;;  %3613 = vmatmul.mubr.msk.f32.gmra.mxu0 %vm1732_vm4, %v2072_v63 }
 0x57e   : > { %3625 = vmatprep.mubr.msk.f32.mxu0 %vm1732_vm4, %v2077_v21  ;;  %3842 = vrcp.f32 %v1990_v47 }
 0x57f   : > { %3844 = vrcp.f32 %v1993_v56 }
 0x580   : > { %v2014_v54 = vpop.xlane.xlu0 %2013  ;;  %3846 = vrcp.f32 %v1996_v33 }
 0x581   : > { %3848 = vrcp.f32 %v2011_v58 }
 0x582   : > { %v3839_v59 = vpop.eup %3838  ;;  %3850 = vrcp.f32 %v2014_v54 }
 0x583   : > { %v2078_v37 = vmul.f32 %v3839_v59, %v4517_v15  ;;  %v3016_v59 = vld [vmem:[%s4676_s3] sm:$0xff] }
 0x584   : > { %v2020_v20 = vpop.xlane.xlu0 %2019 }
 0x585   : > { %3626 = vmatmul.mubr.msk.f32.vlgmr.msra.gmra.mxu0 %vm1732_vm4, %v2078_v37  ;;  %3852 = vrcp.f32 %v2020_v20 }
 0x586   : > { %3628 = vmatprep.mubr.msk.f32.mxu0 %vm1732_vm4, %v2079_v49 }
 0x588   : > { %v826_v39 = vpop.permute.xlu0 %825 }
 0x589   : > { %829 = vst.msk [vmem:[#allocation4 + $0x28] sm:$0xff] %vm679_vm3, %v826_v39 }
 0x58a   : > { %v3841_v0 = vpop.eup %3840 }
 0x58b   : > { %v2080_v50 = vmul.f32 %v3841_v0, %v4526_v45  ;;  %v3843_v55 = vpop.eup %3842 }
 0x58c   : > { %v3845_v6 = vpop.eup %3844  ;;  %v2074_v52 = vmul.f32 %v3843_v55, %v4506_v60  ;;  %v3034_v11 = vpop.permute.xlu0 %3033 }
 0x58d   : > { %3629 = vmatmul.mubr.msk.f32.gmra.mxu0 %vm1732_vm4, %v2080_v50  ;;  %v3847_v42 = vpop.eup %3846  ;;  %v2075_v48 = vmul.f32 %v3845_v6, %v4493_v36 }
 0x58e   : > { %v3849_v38 = vpop.eup %3848  ;;  %v2076_v25 = vmul.f32 %v3847_v42, %v4519_v31 }
 0x58f   : > { %v2081_v45 = vmul.f32 %v3849_v38, %v4511_v24  ;;  %v3851_v36 = vpop.eup %3850 }
 0x590   : > { %v929_v15 = vld [vmem:[#allocation4 + $0x28] sm:$0xff]  ;;  %v2082_v56 = vmul.f32 %v3851_v36, %v4537_v57 }
 0x591   : > { %3615 = vmatprep.subr.mxu1 %v929_v15 }
 0x592   : > { %3616 = vmatpush3.msra.mxu1 %v929_v15  ;;  %v3853_v28 = vpop.eup %3852 }
 0x593   : > { %3618 = vmatmul.mubr.msk.f32.vlgmr.msra.gmra.mxu1 %vm1732_vm4, %v2074_v52  ;;  %v2084_v2 = vmul.f32 %v3853_v28, %v4543_v43 }
 0x594   : > { %3620 = vmatprep.mubr.msk.f32.mxu1 %vm1732_vm4, %v2075_v48 }
 0x597   : > { %3621 = vmatmul.mubr.msk.f32.gmra.mxu1 %vm1732_vm4, %v2076_v25 }
 0x598   : > { %3633 = vmatprep.mubr.msk.f32.mxu1 %vm1732_vm4, %v2081_v45 }
 0x5a3   : > { %v2017_v60 = vpop.xlane.xlu1 %2016 }
 0x5a4   : > { %3854 = vrcp.f32 %v2017_v60 }
 0x5a7   : > { %v880_v5 = vpop.permute.xlu1 %879 }
 0x5a8   : > { %883 = vst.msk [vmem:[#allocation4 + $0x38] sm:$0xff] %vm679_vm3, %v880_v5 }
 0x5ab   : > { %v3036_v40 = vpop.permute.xlu1 %3035 }
 0x5ac   : > { %3639 = vmatprep.subr.mxu0 %v3036_v40 }
 0x5ad   : > { %3640 = vmatpush3.msra.mxu0 %v3036_v40 }
 0x5ae   : > { %3641 = vmatprep.subr.mxu0 %v3034_v11 }
 0x5af   : > { %v931_v46 = vld [vmem:[#allocation4 + $0x38] sm:$0xff]  ;;  %3642 = vmatpush3.msra.mxu0 %v3034_v11 }
 0x5b0   : > { %3631 = vmatprep.subr.mxu1 %v931_v46 }
 0x5b1   : > { %v3855_v31 = vpop.eup %3854  ;;  %v3579_v61 = vpop.f32.mrf.mxu0  ;;  %3632 = vmatpush3.msra.mxu1 %v931_v46 }
 0x5b2   : > { %2862 = vst.msk [vmem:[#allocation5 + $0x8] sm:$0xff] %vm679_vm3, %v3579_v61  ;;  %3634 = vmatmul.mubr.msk.f32.vlgmr.msra.gmra.mxu1 %vm1732_vm4, %v2082_v56  ;;  %v2083_v24 = vmul.f32 %v3855_v31, %v4550_v62 }
 0x5b3   : > { %v2163_v30 = vpop.f32.mrf.mxu0 }
 0x5b4   : > { %2861 = vst.msk [vmem:[#allocation5] sm:$0xff] %vm679_vm3, %v2163_v30  ;;  %3636 = vmatprep.mubr.msk.f32.mxu1 %vm1732_vm4, %v2083_v24 }
 0x5b5   : > { %v3582_v32 = vpop.f32.mrf.mxu0 }
 0x5b6   : > { %2864 = vst.msk [vmem:[#allocation5 + $0x18] sm:$0xff] %vm679_vm3, %v3582_v32  ;;  %3637 = vmatmul.mubr.msk.f32.gmra.mxu1 %vm1732_vm4, %v2084_v2 }
 0x5b7   : > { %v2173_v57 = vpop.f32.mrf.mxu0 }
 0x5b8   : > { %2863 = vst.msk [vmem:[#allocation5 + $0x10] sm:$0xff] %vm679_vm3, %v2173_v57 }
 0x616   : > { %v3587_v62 = vpop.f32.mrf.mxu1 }
 0x617   : > { %2871 = vrot.lane.b32.xlu1 %v3587_v62, %s3914_s13 }
 0x618   : > { %v2260_v41 = vpop.f32.mrf.mxu1 }
 0x619   : > { %2869 = vrot.lane.b32.xlu0 %v2260_v41, %s3914_s13 }
 0x61a   : > { %v3595_v43 = vpop.f32.mrf.mxu0 }
 0x61b   : > { %2892 = vrot.lane.b32.xlu1 %v3595_v43, %s3915_s14 }
 0x61c   : > { %v2357_v3 = vpop.f32.mrf.mxu0 }
 0x61d   : > { %2890 = vrot.lane.b32.xlu0 %v2357_v3, %s3915_s14 }
 0x626   : > { %v3590_v58 = vpop.f32.mrf.mxu1 }
 0x627   : > { %2875 = vrot.lane.b32.xlu0 %v3590_v58, %s3914_s13  ;;  %v3355_v58 = vld [vmem:[%s4677_s4 + $0x8] ss:$0 sm:$0xff] }
 0x628   : > { %v2270_v8 = vpop.f32.mrf.mxu1 }
 0x629   : > { %2873 = vrot.lane.b32.xlu1 %v2270_v8, %s3914_s13 }
 0x62a   : > { %v3598_v10 = vpop.f32.mrf.mxu0 }
 0x62b   : > { %2896 = vrot.lane.b32.xlu0 %v3598_v10, %s3915_s14  ;;  %v3360_v10 = vld [vmem:[%s4677_s4 + $0x9] ss:$0 sm:$0xff] }
 0x62c   : > { %v2367_v47 = vpop.f32.mrf.mxu0 }
 0x62d   : > { %2894 = vrot.lane.b32.xlu1 %v2367_v47, %s3915_s14 }
 0x631   : > { %v3611_v17 = vpop.f32.mrf.mxu0 }
 0x632   : > { %2934 = vrot.lane.b32.xlu0 %v3611_v17, %s3916_s15 }
 0x633   : > { %v2551_v29 = vpop.f32.mrf.mxu0 }
 0x636   : > { %v3603_v7 = vpop.f32.mrf.mxu1 }
 0x637   : > { %2913 = vrot.lane.b32.xlu1 %v3603_v7, %s3917_s16 }
 0x638   : > { %v2454_v22 = vpop.f32.mrf.mxu1 }
 0x639   : > { %2911 = vrot.lane.b32.xlu0 %v2454_v22, %s3917_s16 }
 0x63a   : > { %v3606_v4 = vpop.f32.mrf.mxu1 }
 0x63c   : > { %v2464_v27 = vpop.f32.mrf.mxu1 }
 0x63d   : > { %2932 = vrot.lane.b32.xlu0 %v2551_v29, %s3916_s15  ;;  %2915 = vrot.lane.b32.xlu1 %v2464_v27, %s3917_s16  ;;  %v3614_v44 = vpop.f32.mrf.mxu0 }
 0x63f   : > { %v2561_v19 = vpop.f32.mrf.mxu0 }
 0x641   : > { %2917 = vrot.lane.b32.xlu0 %v3606_v4, %s3917_s16  ;;  %2936 = vrot.lane.b32.xlu1 %v2561_v19, %s3916_s15 }
 0x645   : > { %2938 = vrot.lane.b32.xlu0 %v3614_v44, %s3916_s15  ;;  %v3627_v9 = vpop.f32.mrf.mxu0 }
 0x647   : > { %v2745_v33 = vpop.f32.mrf.mxu0 }
 0x64d   : > { %v3630_v51 = vpop.f32.mrf.mxu0 }
 0x64f   : > { %v2755_v23 = vpop.f32.mrf.mxu0 }
 0x653   : > { %v3619_v14 = vpop.f32.mrf.mxu1 }
 0x654   : > { %2955 = vrot.lane.b32.xlu0 %v3619_v14, %s3918_s18 }
 0x655   : > { %v2648_v1 = vpop.f32.mrf.mxu1 }
 0x656   : > { %2953 = vrot.lane.b32.xlu1 %v2648_v1, %s3918_s18 }
 0x657   : > { %v3622_v35 = vpop.f32.mrf.mxu1 }
 0x658   : > { %2976 = vrot.lane.b32.xlu0 %v3627_v9, %s3919_s19 }
 0x659   : > { %v2658_v12 = vpop.f32.mrf.mxu1 }
 0x65a   : > { %2974 = vrot.lane.b32.xlu1 %v2745_v33, %s3919_s19 }
 0x65c   : > { %2959 = vrot.lane.b32.xlu0 %v3622_v35, %s3918_s18 }
 0x65e   : > { %2980 = vrot.lane.b32.xlu1 %v3630_v51, %s3919_s19 }
 0x662   : > { %2957 = vrot.lane.b32.xlu1 %v2658_v12, %s3918_s18 }
 0x666   : > { %2978 = vrot.lane.b32.xlu1 %v2755_v23, %s3919_s19 }
 0x672   : > { %v3635_v63 = vpop.f32.mrf.mxu1 }
 0x673   : > { %2997 = vrot.lane.b32.xlu0 %v3635_v63, %s3920_s25 }
 0x674   : > { %v2842_v26 = vpop.f32.mrf.mxu1 }
 0x675   : > { %2995 = vrot.lane.b32.xlu1 %v2842_v26, %s3920_s25 }
 0x676   : > { %v3638_v21 = vpop.f32.mrf.mxu1 }
 0x678   : > { %v2852_v54 = vpop.f32.mrf.mxu1 }
 0x679   : > { %3001 = vrot.lane.b32.xlu1 %v3638_v21, %s3920_s25  ;;  %2999 = vrot.lane.b32.xlu0 %v2852_v54, %s3920_s25 }
 0x67d   : > { %3031 = vrot.lane.b32.xlu0 %v3017_v34, %s3906_s17  ;;  %3029 = vrot.lane.b32.xlu1 %v3016_v59, %s3906_s17 }
 0x689   : > { %v2872_v37 = vpop.permute.xlu1 %2871 }
 0x68a   : > { %2883 = vst.msk [vmem:[#allocation5 + $0x8] sm:$0xff] %vm2881_vm5, %v2872_v37 }
 0x68b   : > { %v2870_v20 = vpop.permute.xlu0 %2869 }
 0x68c   : > { %2882 = vst.msk [vmem:[#allocation5] sm:$0xff] %vm2881_vm5, %v2870_v20 }
 0x68d   : > { %v2893_v49 = vpop.permute.xlu1 %2892 }
 0x68e   : > { %2904 = vst.msk [vmem:[#allocation5 + $0x8] sm:$0xff] %vm2902_vm6, %v2893_v49 }
 0x68f   : > { %v2891_v39 = vpop.permute.xlu0 %2890 }
 0x690   : > { %2903 = vst.msk [vmem:[#allocation5] sm:$0xff] %vm2902_vm6, %v2891_v39 }
 0x699   : > { %v2876_v0 = vpop.permute.xlu0 %2875 }
 0x69a   : > { %2885 = vst.msk [vmem:[#allocation5 + $0x18] sm:$0xff] %vm2881_vm5, %v2876_v0 }
 0x69b   : > { %v2874_v50 = vpop.permute.xlu1 %2873 }
 0x69c   : > { %2884 = vst.msk [vmem:[#allocation5 + $0x10] sm:$0xff] %vm2881_vm5, %v2874_v50 }
 0x69d   : > { %v2897_v55 = vpop.permute.xlu0 %2896 }
 0x69e   : > { %2906 = vst.msk [vmem:[#allocation5 + $0x18] sm:$0xff] %vm2902_vm6, %v2897_v55 }
 0x69f   : > { %v2895_v6 = vpop.permute.xlu1 %2894 }
 0x6a0   : > { %2905 = vst.msk [vmem:[#allocation5 + $0x10] sm:$0xff] %vm2902_vm6, %v2895_v6 }
 0x6a4   : > { %v2935_v15 = vpop.permute.xlu0 %2934 }
 0x6a9   : > { %v2914_v52 = vpop.permute.xlu1 %2913 }
 0x6aa   : > { %2925 = vst.msk [vmem:[#allocation5 + $0x8] sm:$0xff] %vm2923_vm7, %v2914_v52 }
 0x6ab   : > { %v2912_v42 = vpop.permute.xlu0 %2911  ;;  %2946 = vst.msk [vmem:[#allocation5 + $0x8] sm:$0xff] %vm2944_vm8, %v2935_v15 }
 0x6ac   : > { %2924 = vst.msk [vmem:[#allocation5] sm:$0xff] %vm2923_vm7, %v2912_v42 }
 0x6af   : > { %v2916_v48 = vpop.permute.xlu1 %2915  ;;  %v2933_v38 = vpop.permute.xlu0 %2932 }
 0x6b0   : > { %2926 = vst.msk [vmem:[#allocation5 + $0x10] sm:$0xff] %vm2923_vm7, %v2916_v48 }
 0x6b1   : > { %2945 = vst.msk [vmem:[#allocation5] sm:$0xff] %vm2944_vm8, %v2933_v38 }
 0x6b3   : > { %v2937_v25 = vpop.permute.xlu1 %2936  ;;  %v2918_v45 = vpop.permute.xlu0 %2917 }
 0x6b4   : > { %2947 = vst.msk [vmem:[#allocation5 + $0x10] sm:$0xff] %vm2944_vm8, %v2937_v25 }
 0x6b5   : > { %2927 = vst.msk [vmem:[#allocation5 + $0x18] sm:$0xff] %vm2923_vm7, %v2918_v45 }
 0x6b7   : > { %v2939_v60 = vpop.permute.xlu0 %2938 }
 0x6b8   : > { %2948 = vst.msk [vmem:[#allocation5 + $0x18] sm:$0xff] %vm2944_vm8, %v2939_v60 }
 0x6c6   : > { %v2956_v5 = vpop.permute.xlu0 %2955 }
 0x6c7   : > { %2967 = vst.msk [vmem:[#allocation5 + $0x8] sm:$0xff] %vm2965_vm9, %v2956_v5 }
 0x6c8   : > { %v2954_v36 = vpop.permute.xlu1 %2953 }
 0x6c9   : > { %2966 = vst.msk [vmem:[#allocation5] sm:$0xff] %vm2965_vm9, %v2954_v36 }
 0x6ca   : > { %v2977_v46 = vpop.permute.xlu0 %2976 }
 0x6cb   : > { %2988 = vst.msk [vmem:[#allocation5 + $0x8] sm:$0xff] %vm2986_vm10, %v2977_v46 }
 0x6cc   : > { %v2975_v28 = vpop.permute.xlu1 %2974 }
 0x6cd   : > { %2987 = vst.msk [vmem:[#allocation5] sm:$0xff] %vm2986_vm10, %v2975_v28 }
 0x6ce   : > { %v2960_v56 = vpop.permute.xlu0 %2959 }
 0x6cf   : > { %2969 = vst.msk [vmem:[#allocation5 + $0x18] sm:$0xff] %vm2965_vm9, %v2960_v56 }
 0x6d0   : > { %v2981_v31 = vpop.permute.xlu1 %2980 }
 0x6d1   : > { %2990 = vst.msk [vmem:[#allocation5 + $0x18] sm:$0xff] %vm2986_vm10, %v2981_v31 }
 0x6d4   : > { %v2958_v61 = vpop.permute.xlu1 %2957 }
 0x6d5   : > { %2968 = vst.msk [vmem:[#allocation5 + $0x10] sm:$0xff] %vm2965_vm9, %v2958_v61 }
 0x6d8   : > { %v2979_v24 = vpop.permute.xlu1 %2978 }
 0x6d9   : > { %2989 = vst.msk [vmem:[#allocation5 + $0x10] sm:$0xff] %vm2986_vm10, %v2979_v24 }
 0x6e5   : > { %v2998_v30 = vpop.permute.xlu0 %2997 }
 0x6e6   : > { %3009 = vst.msk [vmem:[#allocation5 + $0x8] sm:$0xff] %vm3007_vm11, %v2998_v30 }
 0x6e7   : > { %v2996_v2 = vpop.permute.xlu1 %2995 }
 0x6e8   : > { %3008 = vst.msk [vmem:[#allocation5] sm:$0xff] %vm3007_vm11, %v2996_v2 }
 0x6eb   : > { %v3002_v32 = vpop.permute.xlu1 %3001  ;;  %v3000_v57 = vpop.permute.xlu0 %2999 }
 0x6ec   : > { %3011 = vst.msk [vmem:[#allocation5 + $0x18] sm:$0xff] %vm3007_vm11, %v3002_v32  ;;  %3010 = vst.msk [vmem:[#allocation5 + $0x10] sm:$0xff] %vm3007_vm11, %v3000_v57 }
 0x6ed   : > { %v3013_v41 = vld [vmem:[#allocation5 + $0x8] sm:$0xff] }
 0x6ef   : > { %v3032_v40 = vpop.permute.xlu0 %3031  ;;  %v3012_v11 = vld [vmem:[#allocation5] sm:$0xff]  ;;  %v3030_v62 = vpop.permute.xlu1 %3029 }
 0x6f0   : > { %3643 = vmatprep.subr.mxu0 %v3032_v40  ;;  %3647 = vmatprep.mubr.msk.f32.mxu0 %vm373_vm1, %v3012_v11 }
 0x6f1   : > { %3644 = vmatpush3.msra.mxu0 %v3032_v40 }
 0x6f2   : > { %3645 = vmatprep.subr.mxu0 %v3030_v62 }
 0x6f3   : > { %3646 = vmatpush3.msra.mxu0 %v3030_v62  ;;  %v3014_v43 = vld [vmem:[#allocation5 + $0x10] sm:$0xff]  ;;  %v3015_v3 = vld [vmem:[#allocation5 + $0x18] sm:$0xff] }
 0x6f4   : > { %3648 = vmatmul.mubr.msk.f32.vlgmr.msra.gmra.mxu0 %vm373_vm1, %v3013_v41 }
 0x6f5   : > { %3650 = vmatprep.mubr.msk.f32.mxu0 %vm373_vm1, %v3014_v43 }
 0x6f8   : > { %3651 = vmatmul.mubr.msk.f32.gmra.mxu0 %vm373_vm1, %v3015_v3 }
 0x7b4   : > { %v3649_v8 = vpop.f32.mrf.mxu0 }
 0x7b5   : > { %v3125_v47 = vadd.f32 %v3649_v8, %v3355_v58 }
 0x7b6   : > { %v3119_v17 = vpop.f32.mrf.mxu0 }
 0x7b7   : > { %v3144_v7 = vmul.f32 %v3360_v10, %v3125_v47  ;;  %v3120_v22 = vadd.f32 %v3355_v58, %v3119_v17 }
 0x7b8   : > { %v3652_v4 = vpop.f32.mrf.mxu0 }
 0x7b9   : > { %v3148_v29 = vadd.f32 %v3144_v7, %v4066_v13  ;;  %v3143_v27 = vmul.f32 %v3360_v10, %v3120_v22  ;;  %v3135_v44 = vadd.f32 %v3652_v4, %v3355_v58 }
 0x7ba   : > { %v3129_v19 = vpop.f32.mrf.mxu0 }
 0x7bb   : > { %3152 = vst.msk [vmem:[%s279_s12 + $0x8] sm:$0xff] %vm373_vm1, %v3148_v29  ;;  %v3147_v14 = vadd.f32 %v3143_v27, %v4059_v53  ;;  %v3146_v9 = vmul.f32 %v3360_v10, %v3135_v44  ;;  %v3130_v1 = vadd.f32 %v3355_v58, %v3129_v19 }
 0x7bd   : > { %3151 = vst.msk [vmem:[%s279_s12] sm:$0xff] %vm373_vm1, %v3147_v14  ;;  %v3150_v33 = vadd.f32 %v3146_v9, %v4074_v18  ;;  %v3145_v35 = vmul.f32 %v3360_v10, %v3130_v1 }
 0x7bf   : > { %3154 = vst.msk [vmem:[%s279_s12 + $0x18] sm:$0xff] %vm373_vm1, %v3150_v33  ;;  %v3149_v51 = vadd.f32 %v3145_v35, %v4068_v16 }
 0x7c1   : > { %3153 = vst.msk [vmem:[%s279_s12 + $0x10] sm:$0xff] %vm373_vm1, %v3149_v51 }
 0x7c2 PF: > { %s15_s22 = sadd.s32 1, %s3894_s22   ;;  %s4679_s18 = smov %s3886_s20 }
 0x7c3   : > { %p12_p7 = scmp.ge.s32.totalorder %s15_s22, 6   ;;  %s4680_s19 = smov %s3890_s21 }
 0x7c4   : > { %s4681_s20 = smov %s4684_s23  ;;  %s4682_s21 = smov %s4688_s24 }
 0x7c5   :  { %14 = sbr.rel (!%p12_p7) target bundleno = 3 (0x3), region = 94 }

</bundles_post_ra>
